<compile_context>
chip_gen: v5e
topology: v5e:2x2
jax: 0.10.0
libtpu: 0.0.40
codegen_flags: <defaults>
</compile_context>

<pallas_src>
import functools
import math

import jax
import jax.numpy as jnp
from jax.experimental import pallas as pl
from jax.experimental.pallas import tpu as pltpu


# ----------------------------------------------------------------------------
# shape arithmetic mirroring the PyTorch module
# ----------------------------------------------------------------------------
def _col_round(x):
    frac = x - math.floor(x)
    return math.floor(x) if frac <= 0.5 else math.ceil(x)


def _get_filter_dim(seq_length, pooling_sizes):
    filter_dim = seq_length
    for ps in pooling_sizes:
        filter_dim = _col_round(filter_dim / ps)
    return filter_dim


def _round(x):
    return int(round(x))


# ----------------------------------------------------------------------------
# in-kernel exact GELU (erf via Abramowitz&Stegun 7.1.26, f32-accurate)
# ----------------------------------------------------------------------------
def _erf_f32(x):
    p = 0.3275911
    a1, a2, a3, a4, a5 = (0.254829592, -0.284496736, 1.421413741,
                          -1.453152027, 1.061405429)
    ax = jnp.abs(x)
    t = 1.0 / (1.0 + p * ax)
    poly = ((((a5 * t + a4) * t + a3) * t + a2) * t + a1) * t
    y = 1.0 - poly * jnp.exp(-ax * ax)
    return jnp.where(x >= 0, y, -y)


def _gelu(x):
    return 0.5 * x * (1.0 + _erf_f32(x * 0.7071067811865476))


# ----------------------------------------------------------------------------
# the single fused kernel: every layer, activations resident in VMEM
# ----------------------------------------------------------------------------
def _fused_deepcnn_kernel(plan, *refs):
    n_tower = len(plan["tower"])
    it = iter(refs)
    # ---- inputs --------------------------------------------------------
    slab_ref = next(it)                     # (1, L0, K0*Cin0) stem im2col slab
    w0_ref, s0_ref = next(it), next(it)     # (K0*Cin0, C0), (1, C0)
    tw_refs, ts_refs = [], []
    for _ in range(n_tower):
        tw_refs.append(next(it))            # (K, Cin, Cout)  (BN scale folded)
        ts_refs.append(next(it))            # (1, Cout)       (bias+BN shift)
    wp_ref, sp_ref = next(it), next(it)     # (Ct, Cpre), (1, Cpre)
    w1_ref, sb_ref = next(it), next(it)     # (Lf*Cpre, nb), (1, nb)
    w2_ref, b2_ref = next(it), next(it)     # (nb, ncells), (1, ncells)
    # ---- output --------------------------------------------------------
    o_ref = next(it)                        # (1, 1, ncells)
    # ---- scratch -------------------------------------------------------
    y0_ref = next(it)                       # (L0, C0) pre-pool stem activations
    xp_refs, y_refs = [], []
    for _ in range(n_tower):
        xp_refs.append(next(it))            # (L + 2*pad, Cin) padded input
        y_refs.append(next(it))             # (L, Cout) pre-pool activations
    ap_ref = next(it)                       # (Lf, Cpre) pre-bottleneck output

    def pool_gelu(y_ref, L, P):
        # MaxPool1d(P) (floor mode) + exact GELU, via strided VMEM reads.
        lout = L // P
        pooled = y_ref[pl.ds(0, lout, stride=P), :]
        for p in range(1, P):
            pooled = jnp.maximum(pooled, y_ref[pl.ds(p, lout, stride=P), :])
        return _gelu(pooled)

    # ---- stem: single im2col matmul (+ folded BN shift), pool, GELU -----
    st = plan["stem"]
    y0_ref[...] = jnp.dot(slab_ref[0, :, :], w0_ref[...],
                          preferred_element_type=jnp.float32) + s0_ref[...]
    act = pool_gelu(y0_ref, st["L"], st["P"])            # (L0//P0, C0)

    # ---- tower: K-tap conv (BN folded into weights), pool, GELU ---------
    for i, lc in enumerate(plan["tower"]):
        L, K, cout, P = lc["L"], lc["K"], lc["Cout"], lc["P"]
        pad = K // 2
        xp_ref = xp_refs[i]
        xp_ref[...] = jnp.zeros(xp_ref.shape, xp_ref.dtype)   # zero the halo
        xp_ref[pad:pad + L, :] = act
        acc = jnp.zeros((L, cout), jnp.float32)
        for k in range(K):                 # K shifted MXU matmuls, unrolled
            acc = acc + jnp.dot(xp_ref[k:k + L, :], tw_refs[i][k],
                                preferred_element_type=jnp.float32)
        y_refs[i][...] = acc + ts_refs[i][...]
        act = pool_gelu(y_refs[i], L, P)

    # ---- pre-bottleneck: 1x1 conv == one matmul (pool=1), GELU ----------
    ap_ref[...] = _gelu(
        jnp.dot(act, wp_ref[...], preferred_element_type=jnp.float32)
        + sp_ref[...])

    # ---- bottleneck Linear (+ folded eval-mode BN; dropout = identity) --
    # torch flattens channel-major; w1 was pre-permuted to length-major rows,
    # so the contraction is done per sequence position (no in-kernel reshape).
    Lf, Cpre = plan["Lf"], plan["Cpre"]
    h = sb_ref[...]                                        # (1, nb)
    for l in range(Lf):
        h = h + jnp.dot(ap_ref[l:l + 1, :],
                        w1_ref[l * Cpre:(l + 1) * Cpre, :],
                        preferred_element_type=jnp.float32)

    # ---- final Linear + Softmax(dim=1) ----------------------------------
    logits = jnp.dot(h, w2_ref[...],
                     preferred_element_type=jnp.float32) + b2_ref[...]
    m = jnp.max(logits, axis=-1, keepdims=True)
    e = jnp.exp(logits - m)
    o_ref[0, :, :] = e / jnp.sum(e, axis=-1, keepdims=True)


# ----------------------------------------------------------------------------
# forward pass: one pallas_call; the only wrapper glue is the (tiny, one-time)
# NCL->NLC transpose and the stem im2col slab construction.
# ----------------------------------------------------------------------------
def deepcnn_forward(params, x_ncl):
    """x_ncl: (B, 4, L) float32, NCL layout like the PyTorch module."""
    plan = params["plan"]
    st = plan["stem"]
    B = x_ncl.shape[0]
    L0, K0, Cin0 = st["L"], st["K"], st["Cin"]
    pad0 = K0 // 2

    x = jnp.transpose(x_ncl, (0, 2, 1)).astype(jnp.float32)        # (B, L, 4)
    xpad = jnp.pad(x, ((0, 0), (pad0, pad0), (0, 0)))
    # stem im2col slab: slab[b, l, k*Cin + c] = xpad[b, l + k, c]
    slab = jnp.concatenate([xpad[:, k:k + L0, :] for k in range(K0)], axis=-1)

    operands = [slab, params["w0"], params["s0"]]
    for lw, ls in zip(params["tower_w"], params["tower_s"]):
        operands += [lw, ls]
    operands += [params["wp"], params["sp"], params["w1"], params["sb"],
                 params["w2"], params["b2"]]

    def const_map(rank):
        return lambda b: (0,) * rank

    in_specs = [pl.BlockSpec((1, L0, K0 * Cin0), lambda b: (b, 0, 0))]
    for op in operands[1:]:
        in_specs.append(pl.BlockSpec(op.shape, const_map(op.ndim)))

    ncells = params["w2"].shape[1]
    scratch = [pltpu.VMEM((st["L"], st["Cout"]), jnp.float32)]
    for lc in plan["tower"]:
        scratch.append(pltpu.VMEM((lc["L"] + 2 * (lc["K"] // 2), lc["Cin"]),
                                  jnp.float32))
        scratch.append(pltpu.VMEM((lc["L"], lc["Cout"]), jnp.float32))
    scratch.append(pltpu.VMEM((plan["Lf"], plan["Cpre"]), jnp.float32))

    kernel = functools.partial(_fused_deepcnn_kernel, plan)
    out = pl.pallas_call(
        kernel,
        out_shape=jax.ShapeDtypeStruct((B, 1, ncells), jnp.float32),
        grid=(B,),
        in_specs=in_specs,
        out_specs=pl.BlockSpec((1, 1, ncells), lambda b: (b, 0, 0)),
        scratch_shapes=scratch,
        compiler_params=pltpu.CompilerParams(
            dimension_semantics=("parallel",)),
    )(*operands)
    return out.reshape(B, ncells)


# ----------------------------------------------------------------------------
# deterministic synthetic parameters ("raw" form mirrors the torch module)
# ----------------------------------------------------------------------------
def init_deepcnn_params(key, *, n_cells, n_filters_init, n_repeat_blocks_tower,
                        filters_mult, n_filters_pre_bottleneck,
                        n_bottleneck_layer, genomic_seq_length):
    keys = iter(jax.random.split(key, 256))

    def bn_raw(c):
        return dict(
            gamma=1.0 + 0.1 * jax.random.normal(next(keys), (c,), jnp.float32),
            beta=0.1 * jax.random.normal(next(keys), (c,), jnp.float32),
            mean=0.1 * jax.random.normal(next(keys), (c,), jnp.float32),
            var=1.0 + 0.1 * jax.random.uniform(next(keys), (c,), jnp.float32))

    def conv_raw(cin, cout, k, pool):
        w = jax.random.normal(next(keys), (k, cin, cout), jnp.float32)
        w = w * (1.0 / math.sqrt(cin * k))
        b = 0.01 * jax.random.normal(next(keys), (cout,), jnp.float32)
        d = dict(w=w, b=b, pool=pool, k=k, cin=cin, cout=cout)
        d.update(bn_raw(cout))
        return d

    conv_layers = [conv_raw(4, n_filters_init, 17, 3)]          # stem
    curr = n_filters_init
    for _ in range(n_repeat_blocks_tower):                      # tower
        nxt = _round(curr * filters_mult)
        conv_layers.append(conv_raw(curr, nxt, 5, 2))
        curr = nxt
    conv_layers.append(conv_raw(curr, n_filters_pre_bottleneck, 1, 1))

    pooling_sizes = [3] + [2] * n_repeat_blocks_tower + [1]
    filter_dim = _get_filter_dim(genomic_seq_length, pooling_sizes)
    in_feat = n_filters_pre_bottleneck * filter_dim

    head = dict(
        w1=jax.random.normal(next(keys), (in_feat, n_bottleneck_layer),
                             jnp.float32) * (1.0 / math.sqrt(in_feat)),
        b1=0.01 * jax.random.normal(next(keys), (n_bottleneck_layer,),
                                    jnp.float32),
        w2=jax.random.normal(next(keys), (n_bottleneck_layer, n_cells),
                             jnp.float32) * (1.0 / math.sqrt(n_bottleneck_layer)),
        b2=0.01 * jax.random.normal(next(keys), (n_cells,), jnp.float32))
    head.update(bn_raw(n_bottleneck_layer))

    return dict(conv_layers=conv_layers, head=head,
                filter_dim=filter_dim, seq_length=genomic_seq_length)


# ----------------------------------------------------------------------------
# fold eval-mode BatchNorm into weights/shifts and build the kernel operand set
# ----------------------------------------------------------------------------
def prepare_kernel_params(raw):
    eps = 1e-5

    def bn_fold(layer):
        s = layer["gamma"] / jnp.sqrt(layer["var"] + eps)
        return s, layer["beta"] - layer["mean"] * s

    convs = raw["conv_layers"]
    stem, tower, pre = convs[0], convs[1:-1], convs[-1]
    L = raw["seq_length"]

    # stem: fold BN scale into weights, reshape to im2col layout (K*Cin, Cout)
    s, sh = bn_fold(stem)
    w0 = (stem["w"] * s).reshape(stem["k"] * stem["cin"], stem["cout"])
    s0 = (stem["b"] * s + sh).reshape(1, -1)
    plan_stem = dict(L=L, K=stem["k"], Cin=stem["cin"], Cout=stem["cout"],
                     P=stem["pool"])
    L = L // stem["pool"]

    tower_w, tower_s, plan_tower = [], [], []
    for lc in tower:
        s, sh = bn_fold(lc)
        tower_w.append(lc["w"] * s)                           # (K, Cin, Cout)
        tower_s.append((lc["b"] * s + sh).reshape(1, -1))
        plan_tower.append(dict(L=L, K=lc["k"], Cin=lc["cin"],
                               Cout=lc["cout"], P=lc["pool"]))
        L = L // lc["pool"]

    s, sh = bn_fold(pre)
    wp = pre["w"][0] * s                                      # (Cin, Cpre)
    sp = (pre["b"] * s + sh).reshape(1, -1)
    Lf, Cpre = L, pre["cout"]
    # Mirrors the module's assumption that _get_filter_dim (round-half-up)
    # matches the actual floor-mode pooled length (true for this config).
    assert Lf == raw["filter_dim"], (Lf, raw["filter_dim"])

    hd = raw["head"]
    s = hd["gamma"] / jnp.sqrt(hd["var"] + eps)
    sh = hd["beta"] - hd["mean"] * s
    nb = hd["w1"].shape[1]
    # torch flatten order is channel-major (row index c*Lf + l); permute rows
    # to length-major (l*Cpre + c) for the kernel, fold BN scale into columns.
    w1 = (hd["w1"] * s).reshape(Cpre, Lf, nb).transpose(1, 0, 2).reshape(
        Lf * Cpre, nb)
    sb = (hd["b1"] * s + sh).reshape(1, -1)

    plan = dict(stem=plan_stem, tower=plan_tower, Lf=Lf, Cpre=Cpre)
    return dict(plan=plan, w0=w0, s0=s0, tower_w=tower_w, tower_s=tower_s,
                wp=wp, sp=sp, w1=w1, sb=sb, w2=hd["w2"],
                b2=hd["b2"].reshape(1, -1))


# ----------------------------------------------------------------------------
# pure-JAX (XLA) reference of the module's eval-mode forward, for a sanity check
# ----------------------------------------------------------------------------
def reference_forward(raw, x_ncl):
    eps = 1e-5
    x = jnp.transpose(x_ncl, (0, 2, 1)).astype(jnp.float32)       # (B, L, C)
    B = x.shape[0]
    for lc in raw["conv_layers"]:
        K, P = lc["k"], lc["pool"]
        pad = K // 2
        L = x.shape[1]
        xp = jnp.pad(x, ((0, 0), (pad, pad), (0, 0)))
        y = sum(jnp.einsum("blc,cd->bld", xp[:, k:k + L, :], lc["w"][k])
                for k in range(K)) + lc["b"]
        s = lc["gamma"] / jnp.sqrt(lc["var"] + eps)
        y = y * s + (lc["beta"] - lc["mean"] * s)
        if P > 1:
            Lout = L // P
            y = y[:, :Lout * P, :].reshape(B, Lout, P, -1).max(axis=2)
        x = jax.nn.gelu(y, approximate=False)
    xf = jnp.transpose(x, (0, 2, 1)).reshape(B, -1)               # channel-major
    hd = raw["head"]
    s = hd["gamma"] / jnp.sqrt(hd["var"] + eps)
    h = (xf @ hd["w1"] + hd["b1"]) * s + (hd["beta"] - hd["mean"] * s)
    logits = h @ hd["w2"] + hd["b2"]
    return jax.nn.softmax(logits, axis=-1)


# ----------------------------------------------------------------------------
if __name__ == "__main__":
    B, SEQ = 2, 96
    cfg = dict(n_cells=6,
               n_filters_init=8,
               n_repeat_blocks_tower=2,
               filters_mult=2.0,
               n_filters_pre_bottleneck=16,
               n_bottleneck_layer=8,
               genomic_seq_length=SEQ)

    key = jax.random.PRNGKey(0)
    pkey, xkey = jax.random.split(key)
    raw = init_deepcnn_params(pkey, **cfg)
    params = prepare_kernel_params(raw)

    x = jax.random.normal(xkey, (B, 4, SEQ), jnp.float32)   # NCL, like PyTorch

    fwd = jax.jit(functools.partial(deepcnn_forward, params))
    out = jax.block_until_ready(fwd(x))

    assert out.shape == (B, cfg["n_cells"]), out.shape
    assert bool(jnp.all(jnp.isfinite(out)))
    assert bool(jnp.allclose(jnp.sum(out, axis=1), 1.0, atol=1e-5))

    # structural sanity check vs. plain-XLA reference (loose tolerance to be
    # robust to MXU f32 matmul precision differences between the two paths)
    ref = reference_forward(raw, x)
    assert bool(jnp.allclose(out, ref, atol=2e-2)), (out, ref)

    print("KERNEL_OK")
</pallas_src>

<mosaic_0001>
module attributes {stable_mosaic.version = 11 : i64} {
  func.func @_fused_deepcnn_kernel(%arg0: i32, %arg1: memref<1x96x68xf32, #tpu.memory_space<vmem>>, %arg2: memref<68x8xf32, #tpu.memory_space<vmem>>, %arg3: memref<1x8xf32, #tpu.memory_space<vmem>>, %arg4: memref<5x8x16xf32, #tpu.memory_space<vmem>>, %arg5: memref<1x16xf32, #tpu.memory_space<vmem>>, %arg6: memref<5x16x32xf32, #tpu.memory_space<vmem>>, %arg7: memref<1x32xf32, #tpu.memory_space<vmem>>, %arg8: memref<32x16xf32, #tpu.memory_space<vmem>>, %arg9: memref<1x16xf32, #tpu.memory_space<vmem>>, %arg10: memref<128x8xf32, #tpu.memory_space<vmem>>, %arg11: memref<1x8xf32, #tpu.memory_space<vmem>>, %arg12: memref<8x6xf32, #tpu.memory_space<vmem>>, %arg13: memref<1x6xf32, #tpu.memory_space<vmem>>, %arg14: memref<1x1x6xf32, #tpu.memory_space<vmem>>, %arg15: memref<96x8xf32, #tpu.memory_space<vmem>>, %arg16: memref<36x8xf32, #tpu.memory_space<vmem>>, %arg17: memref<32x16xf32, #tpu.memory_space<vmem>>, %arg18: memref<20x16xf32, #tpu.memory_space<vmem>>, %arg19: memref<16x32xf32, #tpu.memory_space<vmem>>, %arg20: memref<8x16xf32, #tpu.memory_space<vmem>>) attributes {dimension_semantics = [#tpu.dimension_semantics<parallel>], iteration_bounds = array<i64: 2>, scalar_prefetch = 0 : i64, scratch_operands = 6 : i64, tpu.core_type = #tpu.core_type<tc>, window_params = [{transform_indices = @transform_0, window_bounds = array<i64: 1, 96, 68>}, {pipeline_mode = #tpu.pipeline_mode<synchronous>, transform_indices = @transform_1, window_bounds = array<i64: 68, 8>}, {pipeline_mode = #tpu.pipeline_mode<synchronous>, transform_indices = @transform_2, window_bounds = array<i64: 1, 8>}, {pipeline_mode = #tpu.pipeline_mode<synchronous>, transform_indices = @transform_3, window_bounds = array<i64: 5, 8, 16>}, {pipeline_mode = #tpu.pipeline_mode<synchronous>, transform_indices = @transform_4, window_bounds = array<i64: 1, 16>}, {pipeline_mode = #tpu.pipeline_mode<synchronous>, transform_indices = @transform_5, window_bounds = array<i64: 5, 16, 32>}, {pipeline_mode = #tpu.pipeline_mode<synchronous>, transform_indices = @transform_6, window_bounds = array<i64: 1, 32>}, {pipeline_mode = #tpu.pipeline_mode<synchronous>, transform_indices = @transform_7, window_bounds = array<i64: 32, 16>}, {pipeline_mode = #tpu.pipeline_mode<synchronous>, transform_indices = @transform_8, window_bounds = array<i64: 1, 16>}, {pipeline_mode = #tpu.pipeline_mode<synchronous>, transform_indices = @transform_9, window_bounds = array<i64: 128, 8>}, {pipeline_mode = #tpu.pipeline_mode<synchronous>, transform_indices = @transform_10, window_bounds = array<i64: 1, 8>}, {pipeline_mode = #tpu.pipeline_mode<synchronous>, transform_indices = @transform_11, window_bounds = array<i64: 8, 6>}, {pipeline_mode = #tpu.pipeline_mode<synchronous>, transform_indices = @transform_12, window_bounds = array<i64: 1, 6>}, {transform_indices = @transform_13, window_bounds = array<i64: 1, 1, 6>}]} {
    %c0 = arith.constant 0 : index
    %c0_0 = arith.constant 0 : index
    %c0_1 = arith.constant 0 : index
    %0 = vector.load %arg1[%c0, %c0_0, %c0_1] : memref<1x96x68xf32, #tpu.memory_space<vmem>>, vector<1x96x68xf32>
    %1 = vector.shape_cast %0 : vector<1x96x68xf32> to vector<96x68xf32>
    %c0_2 = arith.constant 0 : index
    %c0_3 = arith.constant 0 : index
    %2 = vector.load %arg2[%c0_2, %c0_3] : memref<68x8xf32, #tpu.memory_space<vmem>>, vector<68x8xf32>
    %cst = arith.constant dense<0.000000e+00> : vector<96x8xf32>
    %3 = tpu.matmul %1, %2, %cst {dimension_numbers = #tpu.dot_dimension_numbers<[1], [0], [0], [1], [0, 0, 1, 1], [], []>} : vector<96x68xf32>, vector<68x8xf32>, vector<96x8xf32> -> vector<96x8xf32>
    %c0_4 = arith.constant 0 : index
    %c0_5 = arith.constant 0 : index
    %4 = vector.load %arg3[%c0_4, %c0_5] : memref<1x8xf32, #tpu.memory_space<vmem>>, vector<1x8xf32>
    %5 = vector.broadcast %4 : vector<1x8xf32> to vector<96x8xf32>
    %6 = arith.addf %3, %5 : vector<96x8xf32>
    %c0_6 = arith.constant 0 : index
    %c0_7 = arith.constant 0 : index
    %7 = vector.load %arg15[%c0_6, %c0_7] : memref<96x8xf32, #tpu.memory_space<vmem>>, vector<96x8xf32>
    tpu.vector_store %arg15[%c0_6, %c0_7], %6 {strides = array<i32>} : memref<96x8xf32, #tpu.memory_space<vmem>>, vector<96x8xf32>,
    %c0_8 = arith.constant 0 : index
    %c0_9 = arith.constant 0 : index
    %8 = tpu.strided_load %arg15[%c0_8, %c0_9] {strides = array<i32: 3, 1>} : memref<96x8xf32, #tpu.memory_space<vmem>>, vector<32x8xf32>
    %c1 = arith.constant 1 : index
    %c0_10 = arith.constant 0 : index
    %9 = tpu.strided_load %arg15[%c1, %c0_10] {strides = array<i32: 3, 1>} : memref<96x8xf32, #tpu.memory_space<vmem>>, vector<32x8xf32>
    %10 = arith.maximumf %8, %9 : vector<32x8xf32>
    %c2 = arith.constant 2 : index
    %c0_11 = arith.constant 0 : index
    %11 = tpu.strided_load %arg15[%c2, %c0_11] {strides = array<i32: 3, 1>} : memref<96x8xf32, #tpu.memory_space<vmem>>, vector<32x8xf32>
    %12 = arith.maximumf %10, %11 : vector<32x8xf32>
    %cst_12 = arith.constant 5.000000e-01 : f32
    %13 = vector.broadcast %cst_12 : f32 to vector<32x8xf32>
    %14 = arith.mulf %13, %12 : vector<32x8xf32>
    %cst_13 = arith.constant 0.707106769 : f32
    %15 = vector.broadcast %cst_13 : f32 to vector<32x8xf32>
    %16 = arith.mulf %12, %15 : vector<32x8xf32>
    %17 = math.absf %16 : vector<32x8xf32>
    %cst_14 = arith.constant 0.327591091 : f32
    %18 = vector.broadcast %cst_14 : f32 to vector<32x8xf32>
    %19 = arith.mulf %18, %17 : vector<32x8xf32>
    %cst_15 = arith.constant 1.000000e+00 : f32
    %20 = vector.broadcast %cst_15 : f32 to vector<32x8xf32>
    %21 = arith.addf %20, %19 : vector<32x8xf32>
    %cst_16 = arith.constant 1.000000e+00 : f32
    %22 = vector.broadcast %cst_16 : f32 to vector<32x8xf32>
    %23 = arith.divf %22, %21 : vector<32x8xf32>
    %cst_17 = arith.constant 1.06140542 : f32
    %24 = vector.broadcast %cst_17 : f32 to vector<32x8xf32>
    %25 = arith.mulf %24, %23 : vector<32x8xf32>
    %cst_18 = arith.constant -1.45315206 : f32
    %26 = vector.broadcast %cst_18 : f32 to vector<32x8xf32>
    %27 = arith.addf %25, %26 : vector<32x8xf32>
    %28 = arith.mulf %27, %23 : vector<32x8xf32>
    %cst_19 = arith.constant 1.42141378 : f32
    %29 = vector.broadcast %cst_19 : f32 to vector<32x8xf32>
    %30 = arith.addf %28, %29 : vector<32x8xf32>
    %31 = arith.mulf %30, %23 : vector<32x8xf32>
    %cst_20 = arith.constant -0.284496725 : f32
    %32 = vector.broadcast %cst_20 : f32 to vector<32x8xf32>
    %33 = arith.addf %31, %32 : vector<32x8xf32>
    %34 = arith.mulf %33, %23 : vector<32x8xf32>
    %cst_21 = arith.constant 0.254829586 : f32
    %35 = vector.broadcast %cst_21 : f32 to vector<32x8xf32>
    %36 = arith.addf %34, %35 : vector<32x8xf32>
    %37 = arith.mulf %36, %23 : vector<32x8xf32>
    %cst_22 = arith.constant 0.000000e+00 : f32
    %38 = vector.broadcast %cst_22 : f32 to vector<32x8xf32>
    %39 = arith.subf %38, %17 : vector<32x8xf32>
    %40 = arith.mulf %39, %17 : vector<32x8xf32>
    %41 = math.exp %40 : vector<32x8xf32>
    %42 = arith.mulf %37, %41 : vector<32x8xf32>
    %cst_23 = arith.constant 1.000000e+00 : f32
    %43 = vector.broadcast %cst_23 : f32 to vector<32x8xf32>
    %44 = arith.subf %43, %42 : vector<32x8xf32>
    %cst_24 = arith.constant 0.000000e+00 : f32
    %45 = vector.broadcast %cst_24 : f32 to vector<32x8xf32>
    %46 = arith.cmpf oge, %16, %45 : vector<32x8xf32>
    %cst_25 = arith.constant 0.000000e+00 : f32
    %47 = vector.broadcast %cst_25 : f32 to vector<32x8xf32>
    %48 = arith.subf %47, %44 : vector<32x8xf32>
    %49 = arith.select %46, %44, %48 : vector<32x8xi1>, vector<32x8xf32>
    %cst_26 = arith.constant 1.000000e+00 : f32
    %50 = vector.broadcast %cst_26 : f32 to vector<32x8xf32>
    %51 = arith.addf %50, %49 : vector<32x8xf32>
    %52 = arith.mulf %14, %51 : vector<32x8xf32>
    %cst_27 = arith.constant 0.000000e+00 : f32
    %53 = vector.broadcast %cst_27 : f32 to vector<36x8xf32>
    %c0_28 = arith.constant 0 : index
    %c0_29 = arith.constant 0 : index
    %54 = vector.load %arg16[%c0_28, %c0_29] : memref<36x8xf32, #tpu.memory_space<vmem>>, vector<36x8xf32>
    tpu.vector_store %arg16[%c0_28, %c0_29], %53 {strides = array<i32>} : memref<36x8xf32, #tpu.memory_space<vmem>>, vector<36x8xf32>,
    %c2_30 = arith.constant 2 : index
    %c0_31 = arith.constant 0 : index
    %55 = vector.load %arg16[%c2_30, %c0_31] : memref<36x8xf32, #tpu.memory_space<vmem>>, vector<32x8xf32>
    tpu.vector_store %arg16[%c2_30, %c0_31], %52 {strides = array<i32>} : memref<36x8xf32, #tpu.memory_space<vmem>>, vector<32x8xf32>,
    %cst_32 = arith.constant 0.000000e+00 : f32
    %56 = vector.broadcast %cst_32 : f32 to vector<32x16xf32>
    %c0_33 = arith.constant 0 : index
    %c0_34 = arith.constant 0 : index
    %57 = vector.load %arg16[%c0_33, %c0_34] : memref<36x8xf32, #tpu.memory_space<vmem>>, vector<32x8xf32>
    %c0_35 = arith.constant 0 : index
    %c0_36 = arith.constant 0 : index
    %c0_37 = arith.constant 0 : index
    %58 = vector.load %arg4[%c0_35, %c0_36, %c0_37] : memref<5x8x16xf32, #tpu.memory_space<vmem>>, vector<1x8x16xf32>
    %59 = vector.shape_cast %58 : vector<1x8x16xf32> to vector<8x16xf32>
    %cst_38 = arith.constant dense<0.000000e+00> : vector<32x16xf32>
    %60 = tpu.matmul %57, %59, %cst_38 {dimension_numbers = #tpu.dot_dimension_numbers<[1], [0], [0], [1], [0, 0, 1, 1], [], []>} : vector<32x8xf32>, vector<8x16xf32>, vector<32x16xf32> -> vector<32x16xf32>
    %61 = arith.addf %56, %60 : vector<32x16xf32>
    %c1_39 = arith.constant 1 : index
    %c0_40 = arith.constant 0 : index
    %62 = vector.load %arg16[%c1_39, %c0_40] : memref<36x8xf32, #tpu.memory_space<vmem>>, vector<32x8xf32>
    %c1_41 = arith.constant 1 : index
    %c0_42 = arith.constant 0 : index
    %c0_43 = arith.constant 0 : index
    %63 = vector.load %arg4[%c1_41, %c0_42, %c0_43] : memref<5x8x16xf32, #tpu.memory_space<vmem>>, vector<1x8x16xf32>
    %64 = vector.shape_cast %63 : vector<1x8x16xf32> to vector<8x16xf32>
    %cst_44 = arith.constant dense<0.000000e+00> : vector<32x16xf32>
    %65 = tpu.matmul %62, %64, %cst_44 {dimension_numbers = #tpu.dot_dimension_numbers<[1], [0], [0], [1], [0, 0, 1, 1], [], []>} : vector<32x8xf32>, vector<8x16xf32>, vector<32x16xf32> -> vector<32x16xf32>
    %66 = arith.addf %61, %65 : vector<32x16xf32>
    %c2_45 = arith.constant 2 : index
    %c0_46 = arith.constant 0 : index
    %67 = vector.load %arg16[%c2_45, %c0_46] : memref<36x8xf32, #tpu.memory_space<vmem>>, vector<32x8xf32>
    %c2_47 = arith.constant 2 : index
    %c0_48 = arith.constant 0 : index
    %c0_49 = arith.constant 0 : index
    %68 = vector.load %arg4[%c2_47, %c0_48, %c0_49] : memref<5x8x16xf32, #tpu.memory_space<vmem>>, vector<1x8x16xf32>
    %69 = vector.shape_cast %68 : vector<1x8x16xf32> to vector<8x16xf32>
    %cst_50 = arith.constant dense<0.000000e+00> : vector<32x16xf32>
    %70 = tpu.matmul %67, %69, %cst_50 {dimension_numbers = #tpu.dot_dimension_numbers<[1], [0], [0], [1], [0, 0, 1, 1], [], []>} : vector<32x8xf32>, vector<8x16xf32>, vector<32x16xf32> -> vector<32x16xf32>
    %71 = arith.addf %66, %70 : vector<32x16xf32>
    %c3 = arith.constant 3 : index
    %c0_51 = arith.constant 0 : index
    %72 = vector.load %arg16[%c3, %c0_51] : memref<36x8xf32, #tpu.memory_space<vmem>>, vector<32x8xf32>
    %c3_52 = arith.constant 3 : index
    %c0_53 = arith.constant 0 : index
    %c0_54 = arith.constant 0 : index
    %73 = vector.load %arg4[%c3_52, %c0_53, %c0_54] : memref<5x8x16xf32, #tpu.memory_space<vmem>>, vector<1x8x16xf32>
    %74 = vector.shape_cast %73 : vector<1x8x16xf32> to vector<8x16xf32>
    %cst_55 = arith.constant dense<0.000000e+00> : vector<32x16xf32>
    %75 = tpu.matmul %72, %74, %cst_55 {dimension_numbers = #tpu.dot_dimension_numbers<[1], [0], [0], [1], [0, 0, 1, 1], [], []>} : vector<32x8xf32>, vector<8x16xf32>, vector<32x16xf32> -> vector<32x16xf32>
    %76 = arith.addf %71, %75 : vector<32x16xf32>
    %c4 = arith.constant 4 : index
    %c0_56 = arith.constant 0 : index
    %77 = vector.load %arg16[%c4, %c0_56] : memref<36x8xf32, #tpu.memory_space<vmem>>, vector<32x8xf32>
    %c4_57 = arith.constant 4 : index
    %c0_58 = arith.constant 0 : index
    %c0_59 = arith.constant 0 : index
    %78 = vector.load %arg4[%c4_57, %c0_58, %c0_59] : memref<5x8x16xf32, #tpu.memory_space<vmem>>, vector<1x8x16xf32>
    %79 = vector.shape_cast %78 : vector<1x8x16xf32> to vector<8x16xf32>
    %cst_60 = arith.constant dense<0.000000e+00> : vector<32x16xf32>
    %80 = tpu.matmul %77, %79, %cst_60 {dimension_numbers = #tpu.dot_dimension_numbers<[1], [0], [0], [1], [0, 0, 1, 1], [], []>} : vector<32x8xf32>, vector<8x16xf32>, vector<32x16xf32> -> vector<32x16xf32>
    %81 = arith.addf %76, %80 : vector<32x16xf32>
    %c0_61 = arith.constant 0 : index
    %c0_62 = arith.constant 0 : index
    %82 = vector.load %arg5[%c0_61, %c0_62] : memref<1x16xf32, #tpu.memory_space<vmem>>, vector<1x16xf32>
    %83 = vector.broadcast %82 : vector<1x16xf32> to vector<32x16xf32>
    %84 = arith.addf %81, %83 : vector<32x16xf32>
    %c0_63 = arith.constant 0 : index
    %c0_64 = arith.constant 0 : index
    %85 = vector.load %arg17[%c0_63, %c0_64] : memref<32x16xf32, #tpu.memory_space<vmem>>, vector<32x16xf32>
    tpu.vector_store %arg17[%c0_63, %c0_64], %84 {strides = array<i32>} : memref<32x16xf32, #tpu.memory_space<vmem>>, vector<32x16xf32>,
    %c0_65 = arith.constant 0 : index
    %c0_66 = arith.constant 0 : index
    %86 = tpu.strided_load %arg17[%c0_65, %c0_66] {strides = array<i32: 2, 1>} : memref<32x16xf32, #tpu.memory_space<vmem>>, vector<16x16xf32>
    %c1_67 = arith.constant 1 : index
    %c0_68 = arith.constant 0 : index
    %87 = tpu.strided_load %arg17[%c1_67, %c0_68] {strides = array<i32: 2, 1>} : memref<32x16xf32, #tpu.memory_space<vmem>>, vector<16x16xf32>
    %88 = arith.maximumf %86, %87 : vector<16x16xf32>
    %cst_69 = arith.constant 5.000000e-01 : f32
    %89 = vector.broadcast %cst_69 : f32 to vector<16x16xf32>
    %90 = arith.mulf %89, %88 : vector<16x16xf32>
    %cst_70 = arith.constant 0.707106769 : f32
    %91 = vector.broadcast %cst_70 : f32 to vector<16x16xf32>
    %92 = arith.mulf %88, %91 : vector<16x16xf32>
    %93 = math.absf %92 : vector<16x16xf32>
    %cst_71 = arith.constant 0.327591091 : f32
    %94 = vector.broadcast %cst_71 : f32 to vector<16x16xf32>
    %95 = arith.mulf %94, %93 : vector<16x16xf32>
    %cst_72 = arith.constant 1.000000e+00 : f32
    %96 = vector.broadcast %cst_72 : f32 to vector<16x16xf32>
    %97 = arith.addf %96, %95 : vector<16x16xf32>
    %cst_73 = arith.constant 1.000000e+00 : f32
    %98 = vector.broadcast %cst_73 : f32 to vector<16x16xf32>
    %99 = arith.divf %98, %97 : vector<16x16xf32>
    %cst_74 = arith.constant 1.06140542 : f32
    %100 = vector.broadcast %cst_74 : f32 to vector<16x16xf32>
    %101 = arith.mulf %100, %99 : vector<16x16xf32>
    %cst_75 = arith.constant -1.45315206 : f32
    %102 = vector.broadcast %cst_75 : f32 to vector<16x16xf32>
    %103 = arith.addf %101, %102 : vector<16x16xf32>
    %104 = arith.mulf %103, %99 : vector<16x16xf32>
    %cst_76 = arith.constant 1.42141378 : f32
    %105 = vector.broadcast %cst_76 : f32 to vector<16x16xf32>
    %106 = arith.addf %104, %105 : vector<16x16xf32>
    %107 = arith.mulf %106, %99 : vector<16x16xf32>
    %cst_77 = arith.constant -0.284496725 : f32
    %108 = vector.broadcast %cst_77 : f32 to vector<16x16xf32>
    %109 = arith.addf %107, %108 : vector<16x16xf32>
    %110 = arith.mulf %109, %99 : vector<16x16xf32>
    %cst_78 = arith.constant 0.254829586 : f32
    %111 = vector.broadcast %cst_78 : f32 to vector<16x16xf32>
    %112 = arith.addf %110, %111 : vector<16x16xf32>
    %113 = arith.mulf %112, %99 : vector<16x16xf32>
    %cst_79 = arith.constant 0.000000e+00 : f32
    %114 = vector.broadcast %cst_79 : f32 to vector<16x16xf32>
    %115 = arith.subf %114, %93 : vector<16x16xf32>
    %116 = arith.mulf %115, %93 : vector<16x16xf32>
    %117 = math.exp %116 : vector<16x16xf32>
    %118 = arith.mulf %113, %117 : vector<16x16xf32>
    %cst_80 = arith.constant 1.000000e+00 : f32
    %119 = vector.broadcast %cst_80 : f32 to vector<16x16xf32>
    %120 = arith.subf %119, %118 : vector<16x16xf32>
    %cst_81 = arith.constant 0.000000e+00 : f32
    %121 = vector.broadcast %cst_81 : f32 to vector<16x16xf32>
    %122 = arith.cmpf oge, %92, %121 : vector<16x16xf32>
    %cst_82 = arith.constant 0.000000e+00 : f32
    %123 = vector.broadcast %cst_82 : f32 to vector<16x16xf32>
    %124 = arith.subf %123, %120 : vector<16x16xf32>
    %125 = arith.select %122, %120, %124 : vector<16x16xi1>, vector<16x16xf32>
    %cst_83 = arith.constant 1.000000e+00 : f32
    %126 = vector.broadcast %cst_83 : f32 to vector<16x16xf32>
    %127 = arith.addf %126, %125 : vector<16x16xf32>
    %128 = arith.mulf %90, %127 : vector<16x16xf32>
    %cst_84 = arith.constant 0.000000e+00 : f32
    %129 = vector.broadcast %cst_84 : f32 to vector<20x16xf32>
    %c0_85 = arith.constant 0 : index
    %c0_86 = arith.constant 0 : index
    %130 = vector.load %arg18[%c0_85, %c0_86] : memref<20x16xf32, #tpu.memory_space<vmem>>, vector<20x16xf32>
    tpu.vector_store %arg18[%c0_85, %c0_86], %129 {strides = array<i32>} : memref<20x16xf32, #tpu.memory_space<vmem>>, vector<20x16xf32>,
    %c2_87 = arith.constant 2 : index
    %c0_88 = arith.constant 0 : index
    %131 = vector.load %arg18[%c2_87, %c0_88] : memref<20x16xf32, #tpu.memory_space<vmem>>, vector<16x16xf32>
    tpu.vector_store %arg18[%c2_87, %c0_88], %128 {strides = array<i32>} : memref<20x16xf32, #tpu.memory_space<vmem>>, vector<16x16xf32>,
    %cst_89 = arith.constant 0.000000e+00 : f32
    %132 = vector.broadcast %cst_89 : f32 to vector<16x32xf32>
    %c0_90 = arith.constant 0 : index
    %c0_91 = arith.constant 0 : index
    %133 = vector.load %arg18[%c0_90, %c0_91] : memref<20x16xf32, #tpu.memory_space<vmem>>, vector<16x16xf32>
    %c0_92 = arith.constant 0 : index
    %c0_93 = arith.constant 0 : index
    %c0_94 = arith.constant 0 : index
    %134 = vector.load %arg6[%c0_92, %c0_93, %c0_94] : memref<5x16x32xf32, #tpu.memory_space<vmem>>, vector<1x16x32xf32>
    %135 = vector.shape_cast %134 : vector<1x16x32xf32> to vector<16x32xf32>
    %cst_95 = arith.constant dense<0.000000e+00> : vector<16x32xf32>
    %136 = tpu.matmul %133, %135, %cst_95 {dimension_numbers = #tpu.dot_dimension_numbers<[1], [0], [0], [1], [0, 0, 1, 1], [], []>} : vector<16x16xf32>, vector<16x32xf32>, vector<16x32xf32> -> vector<16x32xf32>
    %137 = arith.addf %132, %136 : vector<16x32xf32>
    %c1_96 = arith.constant 1 : index
    %c0_97 = arith.constant 0 : index
    %138 = vector.load %arg18[%c1_96, %c0_97] : memref<20x16xf32, #tpu.memory_space<vmem>>, vector<16x16xf32>
    %c1_98 = arith.constant 1 : index
    %c0_99 = arith.constant 0 : index
    %c0_100 = arith.constant 0 : index
    %139 = vector.load %arg6[%c1_98, %c0_99, %c0_100] : memref<5x16x32xf32, #tpu.memory_space<vmem>>, vector<1x16x32xf32>
    %140 = vector.shape_cast %139 : vector<1x16x32xf32> to vector<16x32xf32>
    %cst_101 = arith.constant dense<0.000000e+00> : vector<16x32xf32>
    %141 = tpu.matmul %138, %140, %cst_101 {dimension_numbers = #tpu.dot_dimension_numbers<[1], [0], [0], [1], [0, 0, 1, 1], [], []>} : vector<16x16xf32>, vector<16x32xf32>, vector<16x32xf32> -> vector<16x32xf32>
    %142 = arith.addf %137, %141 : vector<16x32xf32>
    %c2_102 = arith.constant 2 : index
    %c0_103 = arith.constant 0 : index
    %143 = vector.load %arg18[%c2_102, %c0_103] : memref<20x16xf32, #tpu.memory_space<vmem>>, vector<16x16xf32>
    %c2_104 = arith.constant 2 : index
    %c0_105 = arith.constant 0 : index
    %c0_106 = arith.constant 0 : index
    %144 = vector.load %arg6[%c2_104, %c0_105, %c0_106] : memref<5x16x32xf32, #tpu.memory_space<vmem>>, vector<1x16x32xf32>
    %145 = vector.shape_cast %144 : vector<1x16x32xf32> to vector<16x32xf32>
    %cst_107 = arith.constant dense<0.000000e+00> : vector<16x32xf32>
    %146 = tpu.matmul %143, %145, %cst_107 {dimension_numbers = #tpu.dot_dimension_numbers<[1], [0], [0], [1], [0, 0, 1, 1], [], []>} : vector<16x16xf32>, vector<16x32xf32>, vector<16x32xf32> -> vector<16x32xf32>
    %147 = arith.addf %142, %146 : vector<16x32xf32>
    %c3_108 = arith.constant 3 : index
    %c0_109 = arith.constant 0 : index
    %148 = vector.load %arg18[%c3_108, %c0_109] : memref<20x16xf32, #tpu.memory_space<vmem>>, vector<16x16xf32>
    %c3_110 = arith.constant 3 : index
    %c0_111 = arith.constant 0 : index
    %c0_112 = arith.constant 0 : index
    %149 = vector.load %arg6[%c3_110, %c0_111, %c0_112] : memref<5x16x32xf32, #tpu.memory_space<vmem>>, vector<1x16x32xf32>
    %150 = vector.shape_cast %149 : vector<1x16x32xf32> to vector<16x32xf32>
    %cst_113 = arith.constant dense<0.000000e+00> : vector<16x32xf32>
    %151 = tpu.matmul %148, %150, %cst_113 {dimension_numbers = #tpu.dot_dimension_numbers<[1], [0], [0], [1], [0, 0, 1, 1], [], []>} : vector<16x16xf32>, vector<16x32xf32>, vector<16x32xf32> -> vector<16x32xf32>
    %152 = arith.addf %147, %151 : vector<16x32xf32>
    %c4_114 = arith.constant 4 : index
    %c0_115 = arith.constant 0 : index
    %153 = vector.load %arg18[%c4_114, %c0_115] : memref<20x16xf32, #tpu.memory_space<vmem>>, vector<16x16xf32>
    %c4_116 = arith.constant 4 : index
    %c0_117 = arith.constant 0 : index
    %c0_118 = arith.constant 0 : index
    %154 = vector.load %arg6[%c4_116, %c0_117, %c0_118] : memref<5x16x32xf32, #tpu.memory_space<vmem>>, vector<1x16x32xf32>
    %155 = vector.shape_cast %154 : vector<1x16x32xf32> to vector<16x32xf32>
    %cst_119 = arith.constant dense<0.000000e+00> : vector<16x32xf32>
    %156 = tpu.matmul %153, %155, %cst_119 {dimension_numbers = #tpu.dot_dimension_numbers<[1], [0], [0], [1], [0, 0, 1, 1], [], []>} : vector<16x16xf32>, vector<16x32xf32>, vector<16x32xf32> -> vector<16x32xf32>
    %157 = arith.addf %152, %156 : vector<16x32xf32>
    %c0_120 = arith.constant 0 : index
    %c0_121 = arith.constant 0 : index
    %158 = vector.load %arg7[%c0_120, %c0_121] : memref<1x32xf32, #tpu.memory_space<vmem>>, vector<1x32xf32>
    %159 = vector.broadcast %158 : vector<1x32xf32> to vector<16x32xf32>
    %160 = arith.addf %157, %159 : vector<16x32xf32>
    %c0_122 = arith.constant 0 : index
    %c0_123 = arith.constant 0 : index
    %161 = vector.load %arg19[%c0_122, %c0_123] : memref<16x32xf32, #tpu.memory_space<vmem>>, vector<16x32xf32>
    tpu.vector_store %arg19[%c0_122, %c0_123], %160 {strides = array<i32>} : memref<16x32xf32, #tpu.memory_space<vmem>>, vector<16x32xf32>,
    %c0_124 = arith.constant 0 : index
    %c0_125 = arith.constant 0 : index
    %162 = tpu.strided_load %arg19[%c0_124, %c0_125] {strides = array<i32: 2, 1>} : memref<16x32xf32, #tpu.memory_space<vmem>>, vector<8x32xf32>
    %c1_126 = arith.constant 1 : index
    %c0_127 = arith.constant 0 : index
    %163 = tpu.strided_load %arg19[%c1_126, %c0_127] {strides = array<i32: 2, 1>} : memref<16x32xf32, #tpu.memory_space<vmem>>, vector<8x32xf32>
    %164 = arith.maximumf %162, %163 : vector<8x32xf32>
    %cst_128 = arith.constant 5.000000e-01 : f32
    %165 = vector.broadcast %cst_128 : f32 to vector<8x32xf32>
    %166 = arith.mulf %165, %164 : vector<8x32xf32>
    %cst_129 = arith.constant 0.707106769 : f32
    %167 = vector.broadcast %cst_129 : f32 to vector<8x32xf32>
    %168 = arith.mulf %164, %167 : vector<8x32xf32>
    %169 = math.absf %168 : vector<8x32xf32>
    %cst_130 = arith.constant 0.327591091 : f32
    %170 = vector.broadcast %cst_130 : f32 to vector<8x32xf32>
    %171 = arith.mulf %170, %169 : vector<8x32xf32>
    %cst_131 = arith.constant 1.000000e+00 : f32
    %172 = vector.broadcast %cst_131 : f32 to vector<8x32xf32>
    %173 = arith.addf %172, %171 : vector<8x32xf32>
    %cst_132 = arith.constant 1.000000e+00 : f32
    %174 = vector.broadcast %cst_132 : f32 to vector<8x32xf32>
    %175 = arith.divf %174, %173 : vector<8x32xf32>
    %cst_133 = arith.constant 1.06140542 : f32
    %176 = vector.broadcast %cst_133 : f32 to vector<8x32xf32>
    %177 = arith.mulf %176, %175 : vector<8x32xf32>
    %cst_134 = arith.constant -1.45315206 : f32
    %178 = vector.broadcast %cst_134 : f32 to vector<8x32xf32>
    %179 = arith.addf %177, %178 : vector<8x32xf32>
    %180 = arith.mulf %179, %175 : vector<8x32xf32>
    %cst_135 = arith.constant 1.42141378 : f32
    %181 = vector.broadcast %cst_135 : f32 to vector<8x32xf32>
    %182 = arith.addf %180, %181 : vector<8x32xf32>
    %183 = arith.mulf %182, %175 : vector<8x32xf32>
    %cst_136 = arith.constant -0.284496725 : f32
    %184 = vector.broadcast %cst_136 : f32 to vector<8x32xf32>
    %185 = arith.addf %183, %184 : vector<8x32xf32>
    %186 = arith.mulf %185, %175 : vector<8x32xf32>
    %cst_137 = arith.constant 0.254829586 : f32
    %187 = vector.broadcast %cst_137 : f32 to vector<8x32xf32>
    %188 = arith.addf %186, %187 : vector<8x32xf32>
    %189 = arith.mulf %188, %175 : vector<8x32xf32>
    %cst_138 = arith.constant 0.000000e+00 : f32
    %190 = vector.broadcast %cst_138 : f32 to vector<8x32xf32>
    %191 = arith.subf %190, %169 : vector<8x32xf32>
    %192 = arith.mulf %191, %169 : vector<8x32xf32>
    %193 = math.exp %192 : vector<8x32xf32>
    %194 = arith.mulf %189, %193 : vector<8x32xf32>
    %cst_139 = arith.constant 1.000000e+00 : f32
    %195 = vector.broadcast %cst_139 : f32 to vector<8x32xf32>
    %196 = arith.subf %195, %194 : vector<8x32xf32>
    %cst_140 = arith.constant 0.000000e+00 : f32
    %197 = vector.broadcast %cst_140 : f32 to vector<8x32xf32>
    %198 = arith.cmpf oge, %168, %197 : vector<8x32xf32>
    %cst_141 = arith.constant 0.000000e+00 : f32
    %199 = vector.broadcast %cst_141 : f32 to vector<8x32xf32>
    %200 = arith.subf %199, %196 : vector<8x32xf32>
    %201 = arith.select %198, %196, %200 : vector<8x32xi1>, vector<8x32xf32>
    %cst_142 = arith.constant 1.000000e+00 : f32
    %202 = vector.broadcast %cst_142 : f32 to vector<8x32xf32>
    %203 = arith.addf %202, %201 : vector<8x32xf32>
    %204 = arith.mulf %166, %203 : vector<8x32xf32>
    %c0_143 = arith.constant 0 : index
    %c0_144 = arith.constant 0 : index
    %205 = vector.load %arg8[%c0_143, %c0_144] : memref<32x16xf32, #tpu.memory_space<vmem>>, vector<32x16xf32>
    %cst_145 = arith.constant dense<0.000000e+00> : vector<8x16xf32>
    %206 = tpu.matmul %204, %205, %cst_145 {dimension_numbers = #tpu.dot_dimension_numbers<[1], [0], [0], [1], [0, 0, 1, 1], [], []>} : vector<8x32xf32>, vector<32x16xf32>, vector<8x16xf32> -> vector<8x16xf32>
    %c0_146 = arith.constant 0 : index
    %c0_147 = arith.constant 0 : index
    %207 = vector.load %arg9[%c0_146, %c0_147] : memref<1x16xf32, #tpu.memory_space<vmem>>, vector<1x16xf32>
    %208 = vector.broadcast %207 : vector<1x16xf32> to vector<8x16xf32>
    %209 = arith.addf %206, %208 : vector<8x16xf32>
    %cst_148 = arith.constant 5.000000e-01 : f32
    %210 = vector.broadcast %cst_148 : f32 to vector<8x16xf32>
    %211 = arith.mulf %210, %209 : vector<8x16xf32>
    %cst_149 = arith.constant 0.707106769 : f32
    %212 = vector.broadcast %cst_149 : f32 to vector<8x16xf32>
    %213 = arith.mulf %209, %212 : vector<8x16xf32>
    %214 = math.absf %213 : vector<8x16xf32>
    %cst_150 = arith.constant 0.327591091 : f32
    %215 = vector.broadcast %cst_150 : f32 to vector<8x16xf32>
    %216 = arith.mulf %215, %214 : vector<8x16xf32>
    %cst_151 = arith.constant 1.000000e+00 : f32
    %217 = vector.broadcast %cst_151 : f32 to vector<8x16xf32>
    %218 = arith.addf %217, %216 : vector<8x16xf32>
    %cst_152 = arith.constant 1.000000e+00 : f32
    %219 = vector.broadcast %cst_152 : f32 to vector<8x16xf32>
    %220 = arith.divf %219, %218 : vector<8x16xf32>
    %cst_153 = arith.constant 1.06140542 : f32
    %221 = vector.broadcast %cst_153 : f32 to vector<8x16xf32>
    %222 = arith.mulf %221, %220 : vector<8x16xf32>
    %cst_154 = arith.constant -1.45315206 : f32
    %223 = vector.broadcast %cst_154 : f32 to vector<8x16xf32>
    %224 = arith.addf %222, %223 : vector<8x16xf32>
    %225 = arith.mulf %224, %220 : vector<8x16xf32>
    %cst_155 = arith.constant 1.42141378 : f32
    %226 = vector.broadcast %cst_155 : f32 to vector<8x16xf32>
    %227 = arith.addf %225, %226 : vector<8x16xf32>
    %228 = arith.mulf %227, %220 : vector<8x16xf32>
    %cst_156 = arith.constant -0.284496725 : f32
    %229 = vector.broadcast %cst_156 : f32 to vector<8x16xf32>
    %230 = arith.addf %228, %229 : vector<8x16xf32>
    %231 = arith.mulf %230, %220 : vector<8x16xf32>
    %cst_157 = arith.constant 0.254829586 : f32
    %232 = vector.broadcast %cst_157 : f32 to vector<8x16xf32>
    %233 = arith.addf %231, %232 : vector<8x16xf32>
    %234 = arith.mulf %233, %220 : vector<8x16xf32>
    %cst_158 = arith.constant 0.000000e+00 : f32
    %235 = vector.broadcast %cst_158 : f32 to vector<8x16xf32>
    %236 = arith.subf %235, %214 : vector<8x16xf32>
    %237 = arith.mulf %236, %214 : vector<8x16xf32>
    %238 = math.exp %237 : vector<8x16xf32>
    %239 = arith.mulf %234, %238 : vector<8x16xf32>
    %cst_159 = arith.constant 1.000000e+00 : f32
    %240 = vector.broadcast %cst_159 : f32 to vector<8x16xf32>
    %241 = arith.subf %240, %239 : vector<8x16xf32>
    %cst_160 = arith.constant 0.000000e+00 : f32
    %242 = vector.broadcast %cst_160 : f32 to vector<8x16xf32>
    %243 = arith.cmpf oge, %213, %242 : vector<8x16xf32>
    %cst_161 = arith.constant 0.000000e+00 : f32
    %244 = vector.broadcast %cst_161 : f32 to vector<8x16xf32>
    %245 = arith.subf %244, %241 : vector<8x16xf32>
    %246 = arith.select %243, %241, %245 : vector<8x16xi1>, vector<8x16xf32>
    %cst_162 = arith.constant 1.000000e+00 : f32
    %247 = vector.broadcast %cst_162 : f32 to vector<8x16xf32>
    %248 = arith.addf %247, %246 : vector<8x16xf32>
    %249 = arith.mulf %211, %248 : vector<8x16xf32>
    %c0_163 = arith.constant 0 : index
    %c0_164 = arith.constant 0 : index
    %250 = vector.load %arg20[%c0_163, %c0_164] : memref<8x16xf32, #tpu.memory_space<vmem>>, vector<8x16xf32>
    tpu.vector_store %arg20[%c0_163, %c0_164], %249 {strides = array<i32>} : memref<8x16xf32, #tpu.memory_space<vmem>>, vector<8x16xf32>,
    %c0_165 = arith.constant 0 : index
    %c0_166 = arith.constant 0 : index
    %251 = vector.load %arg11[%c0_165, %c0_166] : memref<1x8xf32, #tpu.memory_space<vmem>>, vector<1x8xf32>
    %c0_167 = arith.constant 0 : index
    %c0_168 = arith.constant 0 : index
    %252 = vector.load %arg20[%c0_167, %c0_168] : memref<8x16xf32, #tpu.memory_space<vmem>>, vector<1x16xf32>
    %c0_169 = arith.constant 0 : index
    %c0_170 = arith.constant 0 : index
    %253 = vector.load %arg10[%c0_169, %c0_170] : memref<128x8xf32, #tpu.memory_space<vmem>>, vector<16x8xf32>
    %cst_171 = arith.constant dense<0.000000e+00> : vector<1x8xf32>
    %254 = tpu.matmul %252, %253, %cst_171 {dimension_numbers = #tpu.dot_dimension_numbers<[1], [0], [0], [1], [0, 0, 1, 1], [], []>} : vector<1x16xf32>, vector<16x8xf32>, vector<1x8xf32> -> vector<1x8xf32>
    %255 = arith.addf %251, %254 : vector<1x8xf32>
    %c1_172 = arith.constant 1 : index
    %c0_173 = arith.constant 0 : index
    %256 = vector.load %arg20[%c1_172, %c0_173] : memref<8x16xf32, #tpu.memory_space<vmem>>, vector<1x16xf32>
    %c16 = arith.constant 16 : index
    %c0_174 = arith.constant 0 : index
    %257 = vector.load %arg10[%c16, %c0_174] : memref<128x8xf32, #tpu.memory_space<vmem>>, vector<16x8xf32>
    %cst_175 = arith.constant dense<0.000000e+00> : vector<1x8xf32>
    %258 = tpu.matmul %256, %257, %cst_175 {dimension_numbers = #tpu.dot_dimension_numbers<[1], [0], [0], [1], [0, 0, 1, 1], [], []>} : vector<1x16xf32>, vector<16x8xf32>, vector<1x8xf32> -> vector<1x8xf32>
    %259 = arith.addf %255, %258 : vector<1x8xf32>
    %c2_176 = arith.constant 2 : index
    %c0_177 = arith.constant 0 : index
    %260 = vector.load %arg20[%c2_176, %c0_177] : memref<8x16xf32, #tpu.memory_space<vmem>>, vector<1x16xf32>
    %c32 = arith.constant 32 : index
    %c0_178 = arith.constant 0 : index
    %261 = vector.load %arg10[%c32, %c0_178] : memref<128x8xf32, #tpu.memory_space<vmem>>, vector<16x8xf32>
    %cst_179 = arith.constant dense<0.000000e+00> : vector<1x8xf32>
    %262 = tpu.matmul %260, %261, %cst_179 {dimension_numbers = #tpu.dot_dimension_numbers<[1], [0], [0], [1], [0, 0, 1, 1], [], []>} : vector<1x16xf32>, vector<16x8xf32>, vector<1x8xf32> -> vector<1x8xf32>
    %263 = arith.addf %259, %262 : vector<1x8xf32>
    %c3_180 = arith.constant 3 : index
    %c0_181 = arith.constant 0 : index
    %264 = vector.load %arg20[%c3_180, %c0_181] : memref<8x16xf32, #tpu.memory_space<vmem>>, vector<1x16xf32>
    %c48 = arith.constant 48 : index
    %c0_182 = arith.constant 0 : index
    %265 = vector.load %arg10[%c48, %c0_182] : memref<128x8xf32, #tpu.memory_space<vmem>>, vector<16x8xf32>
    %cst_183 = arith.constant dense<0.000000e+00> : vector<1x8xf32>
    %266 = tpu.matmul %264, %265, %cst_183 {dimension_numbers = #tpu.dot_dimension_numbers<[1], [0], [0], [1], [0, 0, 1, 1], [], []>} : vector<1x16xf32>, vector<16x8xf32>, vector<1x8xf32> -> vector<1x8xf32>
    %267 = arith.addf %263, %266 : vector<1x8xf32>
    %c4_184 = arith.constant 4 : index
    %c0_185 = arith.constant 0 : index
    %268 = vector.load %arg20[%c4_184, %c0_185] : memref<8x16xf32, #tpu.memory_space<vmem>>, vector<1x16xf32>
    %c64 = arith.constant 64 : index
    %c0_186 = arith.constant 0 : index
    %269 = vector.load %arg10[%c64, %c0_186] : memref<128x8xf32, #tpu.memory_space<vmem>>, vector<16x8xf32>
    %cst_187 = arith.constant dense<0.000000e+00> : vector<1x8xf32>
    %270 = tpu.matmul %268, %269, %cst_187 {dimension_numbers = #tpu.dot_dimension_numbers<[1], [0], [0], [1], [0, 0, 1, 1], [], []>} : vector<1x16xf32>, vector<16x8xf32>, vector<1x8xf32> -> vector<1x8xf32>
    %271 = arith.addf %267, %270 : vector<1x8xf32>
    %c5 = arith.constant 5 : index
    %c0_188 = arith.constant 0 : index
    %272 = vector.load %arg20[%c5, %c0_188] : memref<8x16xf32, #tpu.memory_space<vmem>>, vector<1x16xf32>
    %c80 = arith.constant 80 : index
    %c0_189 = arith.constant 0 : index
    %273 = vector.load %arg10[%c80, %c0_189] : memref<128x8xf32, #tpu.memory_space<vmem>>, vector<16x8xf32>
    %cst_190 = arith.constant dense<0.000000e+00> : vector<1x8xf32>
    %274 = tpu.matmul %272, %273, %cst_190 {dimension_numbers = #tpu.dot_dimension_numbers<[1], [0], [0], [1], [0, 0, 1, 1], [], []>} : vector<1x16xf32>, vector<16x8xf32>, vector<1x8xf32> -> vector<1x8xf32>
    %275 = arith.addf %271, %274 : vector<1x8xf32>
    %c6 = arith.constant 6 : index
    %c0_191 = arith.constant 0 : index
    %276 = vector.load %arg20[%c6, %c0_191] : memref<8x16xf32, #tpu.memory_space<vmem>>, vector<1x16xf32>
    %c96 = arith.constant 96 : index
    %c0_192 = arith.constant 0 : index
    %277 = vector.load %arg10[%c96, %c0_192] : memref<128x8xf32, #tpu.memory_space<vmem>>, vector<16x8xf32>
    %cst_193 = arith.constant dense<0.000000e+00> : vector<1x8xf32>
    %278 = tpu.matmul %276, %277, %cst_193 {dimension_numbers = #tpu.dot_dimension_numbers<[1], [0], [0], [1], [0, 0, 1, 1], [], []>} : vector<1x16xf32>, vector<16x8xf32>, vector<1x8xf32> -> vector<1x8xf32>
    %279 = arith.addf %275, %278 : vector<1x8xf32>
    %c7 = arith.constant 7 : index
    %c0_194 = arith.constant 0 : index
    %280 = vector.load %arg20[%c7, %c0_194] : memref<8x16xf32, #tpu.memory_space<vmem>>, vector<1x16xf32>
    %c112 = arith.constant 112 : index
    %c0_195 = arith.constant 0 : index
    %281 = vector.load %arg10[%c112, %c0_195] : memref<128x8xf32, #tpu.memory_space<vmem>>, vector<16x8xf32>
    %cst_196 = arith.constant dense<0.000000e+00> : vector<1x8xf32>
    %282 = tpu.matmul %280, %281, %cst_196 {dimension_numbers = #tpu.dot_dimension_numbers<[1], [0], [0], [1], [0, 0, 1, 1], [], []>} : vector<1x16xf32>, vector<16x8xf32>, vector<1x8xf32> -> vector<1x8xf32>
    %283 = arith.addf %279, %282 : vector<1x8xf32>
    %c0_197 = arith.constant 0 : index
    %c0_198 = arith.constant 0 : index
    %284 = vector.load %arg12[%c0_197, %c0_198] : memref<8x6xf32, #tpu.memory_space<vmem>>, vector<8x6xf32>
    %cst_199 = arith.constant dense<0.000000e+00> : vector<1x6xf32>
    %285 = tpu.matmul %283, %284, %cst_199 {dimension_numbers = #tpu.dot_dimension_numbers<[1], [0], [0], [1], [0, 0, 1, 1], [], []>} : vector<1x8xf32>, vector<8x6xf32>, vector<1x6xf32> -> vector<1x6xf32>
    %c0_200 = arith.constant 0 : index
    %c0_201 = arith.constant 0 : index
    %286 = vector.load %arg13[%c0_200, %c0_201] : memref<1x6xf32, #tpu.memory_space<vmem>>, vector<1x6xf32>
    %287 = arith.addf %285, %286 : vector<1x6xf32>
    %cst_202 = arith.constant dense<0xFF800000> : vector<1xf32>
    %288 = vector.multi_reduction <maximumf>, %287, %cst_202 [1] : vector<1x6xf32> to vector<1xf32>
    %289 = vector.shape_cast %288 : vector<1xf32> to vector<1x1xf32>
    %290 = vector.broadcast %289 : vector<1x1xf32> to vector<1x6xf32>
    %291 = arith.subf %287, %290 : vector<1x6xf32>
    %292 = math.exp %291 : vector<1x6xf32>
    %cst_203 = arith.constant dense<0.000000e+00> : vector<1xf32>
    %293 = vector.multi_reduction <add>, %292, %cst_203 [1] : vector<1x6xf32> to vector<1xf32>
    %294 = vector.shape_cast %293 : vector<1xf32> to vector<1x1xf32>
    %295 = vector.broadcast %294 : vector<1x1xf32> to vector<1x6xf32>
    %296 = arith.divf %292, %295 : vector<1x6xf32>
    %c0_204 = arith.constant 0 : index
    %c0_205 = arith.constant 0 : index
    %c0_206 = arith.constant 0 : index
    %297 = vector.load %arg14[%c0_204, %c0_205, %c0_206] : memref<1x1x6xf32, #tpu.memory_space<vmem>>, vector<1x1x6xf32>
    %298 = vector.shape_cast %297 : vector<1x1x6xf32> to vector<1x6xf32>
    %299 = vector.shape_cast %296 : vector<1x6xf32> to vector<1x1x6xf32>
    tpu.vector_store %arg14[%c0_204, %c0_205, %c0_206], %299 {strides = array<i32>} : memref<1x1x6xf32, #tpu.memory_space<vmem>>, vector<1x1x6xf32>,
    return
  }
  func.func @transform_0(%arg0: i32) -> (i32, i32, i32) {
    %c0_i32 = arith.constant 0 : i32
    %c0_i32_0 = arith.constant 0 : i32
    %c0_i32_1 = arith.constant 0 : i32
    return %arg0, %c0_i32, %c0_i32_0 : i32, i32, i32
  }
  func.func @transform_1(%arg0: i32) -> (i32, i32) {
    %c0_i32 = arith.constant 0 : i32
    %c0_i32_0 = arith.constant 0 : i32
    %c0_i32_1 = arith.constant 0 : i32
    return %c0_i32, %c0_i32_0 : i32, i32
  }
  func.func @transform_2(%arg0: i32) -> (i32, i32) {
    %c0_i32 = arith.constant 0 : i32
    %c0_i32_0 = arith.constant 0 : i32
    %c0_i32_1 = arith.constant 0 : i32
    return %c0_i32, %c0_i32_0 : i32, i32
  }
  func.func @transform_3(%arg0: i32) -> (i32, i32, i32) {
    %c0_i32 = arith.constant 0 : i32
    %c0_i32_0 = arith.constant 0 : i32
    %c0_i32_1 = arith.constant 0 : i32
    %c0_i32_2 = arith.constant 0 : i32
    return %c0_i32, %c0_i32_0, %c0_i32_1 : i32, i32, i32
  }
  func.func @transform_4(%arg0: i32) -> (i32, i32) {
    %c0_i32 = arith.constant 0 : i32
    %c0_i32_0 = arith.constant 0 : i32
    %c0_i32_1 = arith.constant 0 : i32
    return %c0_i32, %c0_i32_0 : i32, i32
  }
  func.func @transform_5(%arg0: i32) -> (i32, i32, i32) {
    %c0_i32 = arith.constant 0 : i32
    %c0_i32_0 = arith.constant 0 : i32
    %c0_i32_1 = arith.constant 0 : i32
    %c0_i32_2 = arith.constant 0 : i32
    return %c0_i32, %c0_i32_0, %c0_i32_1 : i32, i32, i32
  }
  func.func @transform_6(%arg0: i32) -> (i32, i32) {
    %c0_i32 = arith.constant 0 : i32
    %c0_i32_0 = arith.constant 0 : i32
    %c0_i32_1 = arith.constant 0 : i32
    return %c0_i32, %c0_i32_0 : i32, i32
  }
  func.func @transform_7(%arg0: i32) -> (i32, i32) {
    %c0_i32 = arith.constant 0 : i32
    %c0_i32_0 = arith.constant 0 : i32
    %c0_i32_1 = arith.constant 0 : i32
    return %c0_i32, %c0_i32_0 : i32, i32
  }
  func.func @transform_8(%arg0: i32) -> (i32, i32) {
    %c0_i32 = arith.constant 0 : i32
    %c0_i32_0 = arith.constant 0 : i32
    %c0_i32_1 = arith.constant 0 : i32
    return %c0_i32, %c0_i32_0 : i32, i32
  }
  func.func @transform_9(%arg0: i32) -> (i32, i32) {
    %c0_i32 = arith.constant 0 : i32
    %c0_i32_0 = arith.constant 0 : i32
    %c0_i32_1 = arith.constant 0 : i32
    return %c0_i32, %c0_i32_0 : i32, i32
  }
  func.func @transform_10(%arg0: i32) -> (i32, i32) {
    %c0_i32 = arith.constant 0 : i32
    %c0_i32_0 = arith.constant 0 : i32
    %c0_i32_1 = arith.constant 0 : i32
    return %c0_i32, %c0_i32_0 : i32, i32
  }
  func.func @transform_11(%arg0: i32) -> (i32, i32) {
    %c0_i32 = arith.constant 0 : i32
    %c0_i32_0 = arith.constant 0 : i32
    %c0_i32_1 = arith.constant 0 : i32
    return %c0_i32, %c0_i32_0 : i32, i32
  }
  func.func @transform_12(%arg0: i32) -> (i32, i32) {
    %c0_i32 = arith.constant 0 : i32
    %c0_i32_0 = arith.constant 0 : i32
    %c0_i32_1 = arith.constant 0 : i32
    return %c0_i32, %c0_i32_0 : i32, i32
  }
  func.func @transform_13(%arg0: i32) -> (i32, i32, i32) {
    %c0_i32 = arith.constant 0 : i32
    %c0_i32_0 = arith.constant 0 : i32
    %c0_i32_1 = arith.constant 0 : i32
    return %arg0, %c0_i32, %c0_i32_0 : i32, i32, i32
  }
}

</mosaic_0001>

<bundles_post_ra>
// kernel: deepcnn_forward.1
= control target key start
LH: loop header
LB: loop body
LE: loop exit
PB: predicated region body
PF: predicated region fallthrough
CT: control target
= control target key end

     0   :  { %18 = vsyncpa [#allocation9], 0  ;;  %s2456_s0 = inlined_call_operand.vmem [shape: f32[2,96,68], index: 0, kind: input, shape index: {}]   ;;  %s2457_s1 = inlined_call_operand.vmem [shape: f32[68,8], index: 1, kind: input, shape index: {}]   ;;  %s2458_s2 = inlined_call_operand.vmem [shape: f32[1,8], index: 2, kind: input, shape index: {}]   ;;  %s2459_s3 = inlined_call_operand.vmem [shape: f32[5,8,16], index: 3, kind: input, shape index: {}]   ;;  %s2460_s4 = inlined_call_operand.vmem [shape: f32[1,16], index: 4, kind: input, shape index: {}]   ;;  %s2461_s5 = inlined_call_operand.vmem [shape: f32[5,16,32], index: 5, kind: input, shape index: {}]   ;;  %s2462_s6 = inlined_call_operand.vmem [shape: f32[1,32], index: 6, kind: input, shape index: {}]   ;;  %s2463_s7 = inlined_call_operand.vmem [shape: f32[32,16], index: 7, kind: input, shape index: {}]   ;;  %s2464_s8 = inlined_call_operand.vmem [shape: f32[1,16], index: 8, kind: input, shape index: {}]   ;;  %s2465_s9 = inlined_call_operand.vmem [shape: f32[128,8], index: 9, kind: input, shape index: {}]   ;;  %s2466_s10 = inlined_call_operand.vmem [shape: f32[1,8], index: 10, kind: input, shape index: {}]   ;;  %s2467_s11 = inlined_call_operand.vmem [shape: f32[8,6], index: 11, kind: input, shape index: {}]   ;;  %s2468_s12 = inlined_call_operand.vmem [shape: f32[1,6], index: 12, kind: input, shape index: {}]   ;;  %s2469_s13 = inlined_call_operand.hbm [shape: f32[2,1,6], index: 13, kind: output, shape index: {}]  }
   0x1   :  { %20 = vsyncpa [#allocation9 + $0x1], 0  ;;  %s2049_s25 = smov 0   ;;  %s2051_s26 = smov 0  }
   0x2   :  { %s2053_s27 = smov 0   ;;  %s2055_s28 = smov 0  }
   0x3 LB: > { %2475 = sst [smem:[#allocation11_spill]] %s1964_s25  ;;  %s2070_s29 = sadd.s32 4294967295, %s1976_s28   ;;  %s1976_s28 = sphi %s2055_s28, %s2484_s28   ;;  %s1972_s27 = sphi %s2053_s27, %s2489_s27   ;;  %s1968_s26 = sphi %s2051_s26, %s2488_s26   ;;  %s1964_s25 = sphi %s2049_s25, %s2487_s25  }
   0x4   : > { %2476 = sst [smem:[#allocation12_spill]] %s1972_s27  ;;  %s1761_s30 = sadd.s32 4294967294, %s1976_s28  }
   0x5   : > { %s2074_s14 = sadd.s32 1, %s1976_s28   ;;  %s311_s15 = sadd.s32 1, %s1972_s27 }
   0x6   : > { %2477 = sst [smem:[#allocation13_spill]] %s2074_s14  ;;  %s308_s16 = ssub.s32 %s1976_s28, %s2074_s14 }
   0x7   : > { %p321_p0 = scmp.ne.s32.totalorder %s1972_s27, %s1968_s26  ;;  %p309_p1 = scmp.eq.s32.totalorder %s308_s16, 0 }
   0x8   : > { %p322_p2 = scmp.eq.s32.totalorder %s2070_s29, 1  ;;  %p327_p3 = scmp.ne.s32.totalorder %s1968_s26, %s1964_s25 }
   0x9   : > { %p328_p4 = scmp.eq.s32.totalorder %s1761_s30, 1  ;;  %p1764_p7 = scmp.ge.s32.totalorder %s1976_s28, 1 }
   0xa   : > { %s2085_s17 = scalar_select %p309_p1, %s1972_s27, %s311_s15  }
   0xb   : > { %p2087_p5 = por %p322_p2, %p321_p0  ;;  %p2091_p6 = por %p328_p4, %p327_p3 }
   0xc   : > { %2478 = sst [smem:[#allocation14_spill]] %s2085_s17  ;;  %p390_p8 = scmp.lt.s32.totalorder %s1976_s28, 3 }
   0xd   : > { %s2480_s19 = scalar_select %p2091_p6, 1, 0 }
   0xe   : > { %p391_p9 = pnand %p1764_p7, %p390_p8 }
   0xf   : > { %2481 = sst [smem:[#allocation15_spill]] %s2480_s19  ;;  %p433_p10 = scmp.lt.s32.totalorder (!%p391_p9), %s2070_s29, 1 }
  0x10   : > { %394 = sbr.rel (%p391_p9) target bundleno = 1539 (0x603), region = 72  ;;  %s431_s23 = sand.u32 (!%p391_p9), 1, %s1968_s26  }
  0x11   : > { %s1702_s15 = scalar_lea.hbm (!%p391_p9), %s2469_s13, %s2070_s29  ;;  %s432_s16 = scalar_lea.vmem (!%p391_p9), [#allocation8], %s431_s23 }
  0x12   : > { %s1706_s21 = sshll.u32 (!%p391_p9), %s1702_s15, 4  ;;  %s1694_s25 = scalar_lea.sflag (!%p391_p9), [#allocation9], %s431_s23  ;;  %s1707_s21 = int_to_ptr.hbm [resolvable:$true] %s1706_s21 }
  0x15   : > { %v458_v0 = vld [vmem:[%s2457_s1 + $0x40] sm:$0xf]  ;;  %vm500_vm0 = vcmask 1043456   ;;  %v457_v1 = vld [vmem:[%s2457_s1 + $0x38] sm:$0xff]  ;;  %v456_v2 = vld [vmem:[%s2457_s1 + $0x30] sm:$0xff]  ;;  %s434_s20 = scalar_select %p433_p10, %s2070_s29, 1 }
  0x16   : > { %1766 = vmatpush.msk.msra.mxu0 %vm500_vm0, %v458_v0  ;;  %v455_v3 = vld [vmem:[%s2457_s1 + $0x28] sm:$0xff]  ;;  %v454_v4 = vld [vmem:[%s2457_s1 + $0x20] sm:$0xff]  ;;  %v453_v5 = vld [vmem:[%s2457_s1 + $0x18] sm:$0xff]  ;;  %vm463_vm1 = vcmask 556032   ;;  %vm557_vm2 = vcmask 64512   ;;  %v1978_v58 = vmov 0.0  }
  0x17   : > { %s1833_s27 = smul.u32 96, %s434_s20  ;;  %v452_v6 = vld [vmem:[%s2457_s1 + $0x10] sm:$0xff]  ;;  %v451_v7 = vld [vmem:[%s2457_s1 + $0x8] sm:$0xff]  ;;  %v450_v8 = vld [vmem:[%s2457_s1] sm:$0xff]  ;;  %761 = vst.msk [vmem:[#allocation3] sm:$0xff] %vm557_vm2, %v1978_v58  ;;  %s1934_s20 = scalar_lea.hbm %s2469_s13, 2 }
  0x18   : > { %512 = vmatpush.msra.mxu0 %v457_v1  ;;  %v2144_v21 = vld [vmem:[%s2458_s2] ss:$0 sm:$0xff]  ;;  %762 = vst.msk [vmem:[#allocation3 + $0x8] sm:$0xff] %vm557_vm2, %v1978_v58 }
  0x19   : > { %s437_s17 = scalar_lea.vmem %s2456_s0, %s1833_s27  ;;  %763 = vst.msk [vmem:[#allocation3 + $0x10] sm:$0xff] %vm557_vm2, %v1978_v58  ;;  %s1928_s27 = sshra.s32 %s1707_s21, 4  ;;  %s1929_s27 = int_to_ptr.hbm [resolvable:$true] %s1928_s27 }
  0x1a   : > { %513 = vmatpush.msra.mxu0 %v456_v2  ;;  %v438_v9 = vld [vmem:[%s437_s17] sm:$0xff]  ;;  %v439_v10 = vld [vmem:[%s437_s17 + $0x8] sm:$0xff]  ;;  %v440_v11 = vld [vmem:[%s437_s17 + $0x10] sm:$0xff]  ;;  %764 = vst.msk [vmem:[#allocation3 + $0x18] sm:$0xff] %vm557_vm2, %v1978_v58  ;;  %s1930_s29 = scalar_lea.hbm %s1929_s27, 1  ;;  %p1935_p0 = scmp.lt.s32.totalorder %s1929_s27, %s2469_s13 }
  0x1b   : > { %v441_v12 = vld [vmem:[%s437_s17 + $0x18] sm:$0xff]  ;;  %v442_v13 = vld [vmem:[%s437_s17 + $0x20] sm:$0xff]  ;;  %v443_v14 = vld [vmem:[%s437_s17 + $0x28] sm:$0xff]  ;;  %p1931_p11 = scmp.ne.s32.totalorder %s1929_s27, %s1930_s29  ;;  %p1936_p1 = scmp.lt.s32.totalorder %s1934_s20, %s1930_s29 }
  0x1c   : > { %514 = vmatpush.msra.mxu0 %v455_v3  ;;  %v444_v15 = vld [vmem:[%s437_s17 + $0x30] sm:$0xff]  ;;  %v445_v16 = vld [vmem:[%s437_s17 + $0x38] sm:$0xff]  ;;  %v446_v17 = vld [vmem:[%s437_s17 + $0x40] sm:$0xff] }
  0x1d   : > { %v447_v18 = vld [vmem:[%s437_s17 + $0x48] sm:$0xff]  ;;  %v448_v19 = vld [vmem:[%s437_s17 + $0x50] sm:$0xff]  ;;  %v449_v20 = vld [vmem:[%s437_s17 + $0x58] sm:$0xff]  ;;  %s1704_s17 = sshll.u32 %s432_s16, 4  ;;  %p1932_p12 = pnand %p1931_p11, %p2087_p5  ;;  %s1705_s17 = int_to_ptr.vmem [resolvable:$true] %s1704_s17 }
  0x1e   : > { %515 = vmatpush.msra.mxu0 %v454_v4  ;;  %p1937_p2 = por %p1936_p1, %p1935_p0 }
  0x1f   : > { %p1933_p13 = pneg %p1932_p12 }
  0x20   : > { %516 = vmatpush.msra.mxu0 %v453_v5 }
  0x21   : > { %p1938_p3 = pnand %p1937_p2, %p1933_p13 }
  0x22   : > { %517 = vmatpush.msra.mxu0 %v452_v6 }
  0x24   : > { %518 = vmatpush.msra.mxu0 %v451_v7  ;;  %v1779_v7 = vld [vmem:[%s2459_s3 + $0x8] sm:$0xff] }
  0x25   : > { %809 = vmatpush.msra.mxu1 %v1779_v7 }
  0x26   : > { %519 = vmatpush.msra.mxu0 %v450_v8  ;;  %v775_v8 = vld [vmem:[%s2459_s3] sm:$0xff] }
  0x27   : > { %1767 = vmatmul.msk.f32.vlgmr.msra.gmra.mxu0 %vm463_vm1, %v438_v9  ;;  %v1788_v9 = vld [vmem:[%s2459_s3 + $0x10] sm:$0xff]  ;;  %850 = vmatpush.msra.mxu2 %v775_v8 }
  0x28   : > { %897 = vmatpush.msra.mxu3 %v1788_v9 }
  0x2f   : > { %1768 = vmatmul.msk.f32.gmra.mxu0 %vm463_vm1, %v439_v10 }
  0x37   : > { %1769 = vmatmul.msk.f32.gmra.mxu0 %vm463_vm1, %v440_v11 }
  0x3f   : > { %1770 = vmatmul.msk.f32.gmra.mxu0 %vm463_vm1, %v441_v12 }
  0x47   : > { %1771 = vmatmul.msk.f32.gmra.mxu0 %vm463_vm1, %v442_v13 }
  0x4f   : > { %1772 = vmatmul.msk.f32.gmra.mxu0 %vm463_vm1, %v443_v14 }
  0x57   : > { %1773 = vmatmul.msk.f32.gmra.mxu0 %vm463_vm1, %v444_v15 }
  0x5f   : > { %1774 = vmatmul.msk.f32.gmra.mxu0 %vm463_vm1, %v445_v16 }
  0x67   : > { %1775 = vmatmul.msk.f32.gmra.mxu0 %vm463_vm1, %v446_v17 }
  0x6f   : > { %1776 = vmatmul.msk.f32.gmra.mxu0 %vm463_vm1, %v447_v18 }
  0x77   : > { %1777 = vmatmul.msk.f32.gmra.mxu0 %vm463_vm1, %v448_v19 }
  0x7f   : > { %1778 = vmatmul.msk.f32.gmra.mxu0 %vm463_vm1, %v449_v20 }
  0xa4   : > { %v521_v22 = vpop.f32.mrf.mxu0 }
  0xa5   : > { %v522_v23 = vadd.f32 %v2144_v21, %v521_v22 }
  0xa7   : > { %558 = vst.msk [vmem:[#allocation2] sm:$0xff] %vm557_vm2, %v522_v23 }
  0xac   : > { %v524_v24 = vpop.f32.mrf.mxu0 }
  0xad   : > { %v525_v25 = vadd.f32 %v2144_v21, %v524_v24 }
  0xaf   : > { %559 = vst.msk [vmem:[#allocation2 + $0x8] sm:$0xff] %vm557_vm2, %v525_v25 }
  0xb4   : > { %v527_v26 = vpop.f32.mrf.mxu0 }
  0xb5   : > { %v528_v27 = vadd.f32 %v2144_v21, %v527_v26 }
  0xb7   : > { %560 = vst.msk [vmem:[#allocation2 + $0x10] sm:$0xff] %vm557_vm2, %v528_v27 }
  0xbc   : > { %v530_v28 = vpop.f32.mrf.mxu0 }
  0xbd   : > { %v531_v29 = vadd.f32 %v2144_v21, %v530_v28 }
  0xbe   : > { %v570_v30 = vld [vmem:[#allocation2] ss:$3 sm:$0xff]  ;;  %v578_v31 = vld [vmem:[#allocation2 + $0x1] ss:$3 sm:$0xff]  ;;  %v590_v33 = vld [vmem:[#allocation2 + $0x2] ss:$3 sm:$0xff] }
  0xbf   : > { %v585_v32 = vmax.f32 %v570_v30, %v578_v31  ;;  %561 = vst.msk [vmem:[#allocation2 + $0x18] sm:$0xff] %vm557_vm2, %v531_v29 }
  0xc1   : > { %v2154_v34 = vmax.f32 %v585_v32, %v590_v33 }
  0xc3   : > { %v2157_v35 = vmul.f32 0.70710677, %v2154_v34 }
  0xc4   : > { %v533_v36 = vpop.f32.mrf.mxu0 }
  0xc5   : > { %v609_v37 = vand.u32 2147483647, %v2157_v35  ;;  %v534_v38 = vadd.f32 %v2144_v21, %v533_v36  ;;  %vm741_vm11 = vcmp.ge.f32.partialorder %v2157_v35, 0.0 }
  0xc7   : > { %v613_v39 = vmul.f32 0.3275911, %v609_v37  ;;  %562 = vst.msk [vmem:[#allocation2 + $0x20] sm:$0xff] %vm557_vm2, %v534_v38  ;;  %v717_v61 = vsub.f32 0.0, %v609_v37 }
  0xc9   : > { %v617_v40 = vadd.f32 1.0, %v613_v39  ;;  %v721_v4 = vmul.f32 %v717_v61, %v609_v37 }
  0xcb   : > { %1878 = vrcp.f32 %v617_v40  ;;  %v632_v47 = vand.u32 2147483648, %v617_v40  ;;  %v630_v50 = vand.u32 2147483647, %v617_v40  ;;  %vm626_vm4 = vweird.f32 %v617_v40 }
  0xcc   : > { %v536_v41 = vpop.f32.mrf.mxu0  ;;  %v725_v12 = vmul.f32 1.442695, %v721_v4 }
  0xcd   : > { %v537_v42 = vadd.f32 %v2144_v21, %v536_v41  ;;  %v633_v56 = vor.u32 1.1754944e-38, %v632_v47  ;;  %vm631_vm6 = vcmp.eq.f32.partialorder %v630_v50, 8.507059e+37 }
  0xcf   : > { %563 = vst.msk [vmem:[#allocation2 + $0x28] sm:$0xff] %vm557_vm2, %v537_v42 }
  0xd1   : > { %v1879_v43 = vpop.eup %1878 }
  0xd2   : > { %v622_v44 = vmul.f32 %v1879_v43, %v617_v40  ;;  %vm627_vm3 = vweird.f32 %v1879_v43 }
  0xd3   : > { %vm628_vm5 = vmor %vm626_vm4, %vm627_vm3  ;;  %vm765_vm3 = vcmask 60416  }
  0xd4   : > { %v623_v45 = vsub.f32 1.0, %v622_v44  ;;  %v539_v46 = vpop.f32.mrf.mxu0  ;;  %766 = vst.msk [vmem:[#allocation3 + $0x20] sm:$0xf] %vm765_vm3, %v1978_v58 }
  0xd5   : > { %v540_v48 = vadd.f32 %v2144_v21, %v539_v46 }
  0xd6   : > { %v624_v49 = vmul.f32 %v1879_v43, %v623_v45  ;;  %v572_v51 = vld [vmem:[#allocation2 + $0x18] ss:$3 sm:$0xff]  ;;  %v580_v52 = vld [vmem:[#allocation2 + $0x19] ss:$3 sm:$0xff]  ;;  %v592_v55 = vld [vmem:[#allocation2 + $0x1a] ss:$3 sm:$0xff] }
  0xd7   : > { %v586_v53 = vmax.f32 %v572_v51, %v580_v52  ;;  %564 = vst.msk [vmem:[#allocation2 + $0x30] sm:$0xff] %vm557_vm2, %v540_v48 }
  0xd8   : > { %v625_v54 = vadd.f32 %v1879_v43, %v624_v49  ;;  %v601_v49 = vmul.f32 0.5, %v2154_v34 }
  0xd9   : > { %v2166_v57 = vmax.f32 %v586_v53, %v592_v55 }
  0xda   : > { %v629_v59 = vsel %vm628_vm5, %v1879_v43, %v625_v54 }
  0xdb   : > { %v634_v60 = vsel %vm631_vm6, %v633_v56, %v629_v59  ;;  %v2173_v62 = vmul.f32 0.70710677, %v2166_v57 }
  0xdc   : > { %v681_v63 = vmul.f32 1.0614054, %v634_v60  ;;  %v542_v0 = vpop.f32.mrf.mxu0 }
  0xdd   : > { %v2180_v1 = vand.u32 2147483647, %v2173_v62  ;;  %v543_v2 = vadd.f32 %v2144_v21, %v542_v0  ;;  %vm742_vm0 = vcmp.ge.f32.partialorder %v2173_v62, 0.0 }
  0xde   : > { %v685_v3 = vadd.f32 -1.4531521, %v681_v63 }
  0xdf   : > { %v614_v5 = vmul.f32 0.3275911, %v2180_v1  ;;  %565 = vst.msk [vmem:[#allocation2 + $0x38] sm:$0xff] %vm557_vm2, %v543_v2  ;;  %v718_v44 = vsub.f32 0.0, %v2180_v1 }
  0xe0   : > { %v689_v6 = vmul.f32 %v685_v3, %v634_v60 }
  0xe1   : > { %v618_v10 = vadd.f32 1.0, %v614_v5  ;;  %v722_v35 = vmul.f32 %v718_v44, %v2180_v1 }
  0xe2   : > { %v693_v11 = vadd.f32 1.4214138, %v689_v6 }
  0xe3   : > { %1880 = vrcp.f32 %v618_v10  ;;  %v647_v26 = vand.u32 2147483648, %v618_v10  ;;  %v645_v30 = vand.u32 2147483647, %v618_v10  ;;  %vm641_vm8 = vweird.f32 %v618_v10 }
  0xe4   : > { %v697_v13 = vmul.f32 %v693_v11, %v634_v60  ;;  %v545_v14 = vpop.f32.mrf.mxu0  ;;  %1882 = vpow2.f32 %v725_v12  ;;  %v727_v61 = vmul.f32 1.442695, %v722_v35 }
  0xe5   : > { %v546_v15 = vadd.f32 %v2144_v21, %v545_v14  ;;  %v648_v39 = vor.u32 1.1754944e-38, %v647_v26  ;;  %vm646_vm10 = vcmp.eq.f32.partialorder %v645_v30, 8.507059e+37 }
  0xe6   : > { %v701_v16 = vadd.f32 -0.28449672, %v697_v13 }
  0xe7   : > { %566 = vst.msk [vmem:[#allocation2 + $0x40] sm:$0xff] %vm557_vm2, %v546_v15 }
  0xe8   : > { %v705_v17 = vmul.f32 %v701_v16, %v634_v60 }
  0xe9   : > { %v1881_v18 = vpop.eup %1880 }
  0xea   : > { %v709_v19 = vadd.f32 0.2548296, %v705_v17  ;;  %v637_v20 = vmul.f32 %v1881_v18, %v618_v10  ;;  %v1883_v25 = vpop.eup %1882  ;;  %vm642_vm7 = vweird.f32 %v1881_v18 }
  0xeb   : > { %vm643_vm9 = vmor %vm641_vm8, %vm642_vm7 }
  0xec   : > { %v713_v22 = vmul.f32 %v709_v19, %v634_v60  ;;  %v638_v23 = vsub.f32 1.0, %v637_v20  ;;  %v548_v24 = vpop.f32.mrf.mxu0 }
  0xed   : > { %v549_v27 = vadd.f32 %v2144_v21, %v548_v24 }
  0xee   : > { %v733_v28 = vmul.f32 %v1883_v25, %v713_v22  ;;  %v639_v29 = vmul.f32 %v1881_v18, %v638_v23  ;;  %v574_v31 = vld [vmem:[#allocation2 + $0x30] ss:$3 sm:$0xff]  ;;  %v582_v32 = vld [vmem:[#allocation2 + $0x31] ss:$3 sm:$0xff]  ;;  %v594_v38 = vld [vmem:[#allocation2 + $0x32] ss:$3 sm:$0xff] }
  0xef   : > { %v587_v33 = vmax.f32 %v574_v31, %v582_v32  ;;  %567 = vst.msk [vmem:[#allocation2 + $0x48] sm:$0xff] %vm557_vm2, %v549_v27  ;;  %v602_v31 = vmul.f32 0.5, %v2166_v57 }
  0xf0   : > { %v737_v36 = vsub.f32 1.0, %v733_v28  ;;  %v640_v37 = vadd.f32 %v1881_v18, %v639_v29 }
  0xf1   : > { %v2198_v40 = vmax.f32 %v587_v33, %v594_v38 }
  0xf2   : > { %v745_v41 = vsub.f32 0.0, %v737_v36  ;;  %v644_v42 = vsel %vm643_vm9, %v1881_v18, %v640_v37  ;;  %vm1025_vm9 = vcmask 130048  }
  0xf3   : > { %v649_v43 = vsel %vm646_vm10, %v648_v39, %v644_v42  ;;  %v2203_v45 = vmul.f32 0.70710677, %v2198_v40  ;;  %1119 = vst.msk [vmem:[#allocation5] sm:$0xff] %vm1025_vm9, %v1978_v58 }
  0xf4   : > { %v749_v46 = vsel %vm741_vm11, %v737_v36, %v745_v41  ;;  %v682_v47 = vmul.f32 1.0614054, %v649_v43  ;;  %v551_v48 = vpop.f32.mrf.mxu0  ;;  %1120 = vst.msk [vmem:[#allocation5 + $0x8] sm:$0xff] %vm1025_vm9, %v1978_v58 }
  0xf5   : > { %v753_v50 = vadd.f32 1.0, %v749_v46  ;;  %v611_v51 = vand.u32 2147483647, %v2203_v45  ;;  %v552_v52 = vadd.f32 %v2144_v21, %v551_v48  ;;  %vm743_vm7 = vcmp.ge.f32.partialorder %v2203_v45, 0.0 }
  0xf6   : > { %v686_v53 = vadd.f32 -1.4531521, %v682_v47 }
  0xf7   : > { %v757_v54 = vmul.f32 %v753_v50, %v601_v49  ;;  %v615_v55 = vmul.f32 0.3275911, %v611_v51  ;;  %568 = vst.msk [vmem:[#allocation2 + $0x50] sm:$0xff] %vm557_vm2, %v552_v52  ;;  %v719_v27 = vsub.f32 0.0, %v611_v51 }
  0xf8   : > { %v690_v56 = vmul.f32 %v686_v53, %v649_v43 }
  0xf9   : > { %v619_v59 = vadd.f32 1.0, %v615_v55  ;;  %767 = vst.msk [vmem:[#allocation3 + $0x2] sm:$0xff] %vm557_vm2, %v757_v54  ;;  %v723_v38 = vmul.f32 %v719_v27, %v611_v51 }
  0xfa   : > { %v694_v60 = vadd.f32 1.4214138, %v690_v56 }
  0xfb   : > { %1884 = vrcp.f32 %v619_v59  ;;  %v662_v11 = vand.u32 2147483648, %v619_v59  ;;  %v660_v14 = vand.u32 2147483647, %v619_v59  ;;  %vm656_vm13 = vweird.f32 %v619_v59 }
  0xfc   : > { %v698_v34 = vmul.f32 %v694_v60, %v649_v43  ;;  %v554_v63 = vpop.f32.mrf.mxu0  ;;  %1886 = vpow2.f32 %v727_v61  ;;  %v1798_v61 = vld [vmem:[%s2459_s3 + $0x20] sm:$0xff] }
  0xfd   : > { %v555_v0 = vadd.f32 %v2144_v21, %v554_v63  ;;  %v663_v22 = vor.u32 1.1754944e-38, %v662_v11  ;;  %vm661_vm15 = vcmp.eq.f32.partialorder %v660_v14, 8.507059e+37  ;;  %999 = vmatpush.msrb.mxu2 %v1798_v61 }
  0xfe   : > { %v702_v2 = vadd.f32 -0.28449672, %v698_v34  ;;  %v1793_v34 = vld [vmem:[%s2459_s3 + $0x18] sm:$0xff] }
  0xff   : > { %569 = vst.msk [vmem:[#allocation2 + $0x58] sm:$0xff] %vm557_vm2, %v555_v0  ;;  %948 = vmatpush.msrb.mxu1 %v1793_v34 }
 0x100   : > { %v706_v3 = vmul.f32 %v702_v2, %v649_v43  ;;  %v776_v1 = vld [vmem:[#allocation3 + $0x1] sm:$0xff] }
 0x101   : > { %v771_v4 = vld [vmem:[#allocation3] sm:$0xff]  ;;  %v1885_v6 = vpop.eup %1884  ;;  %1780 = vmatmul.msk.f32.vlgmr.msra.gmra.mxu1 %vm557_vm2, %v776_v1 }
 0x102   : > { %v864_v5 = vld [vmem:[#allocation3 + $0x2] sm:$0xff]  ;;  %1784 = vmatmul.msk.f32.vlgmr.msra.gmra.mxu2 %vm557_vm2, %v771_v4  ;;  %v710_v7 = vadd.f32 0.2548296, %v706_v3  ;;  %v652_v8 = vmul.f32 %v1885_v6, %v619_v59  ;;  %v1887_v21 = vpop.eup %1886  ;;  %vm657_vm12 = vweird.f32 %v1885_v6 }
 0x103   : > { %1789 = vmatmul.msk.f32.vlgmr.msra.gmra.mxu3 %vm557_vm2, %v864_v5  ;;  %vm658_vm14 = vmor %vm656_vm13, %vm657_vm12 }
 0x104   : > { %v714_v9 = vmul.f32 %v710_v7, %v649_v43  ;;  %v653_v10 = vsub.f32 1.0, %v652_v8  ;;  %v729_v43 = vmul.f32 1.442695, %v723_v38  ;;  %v603_v8 = vmul.f32 0.5, %v2198_v40 }
 0x106   : > { %v734_v12 = vmul.f32 %v1887_v21, %v714_v9  ;;  %v654_v13 = vmul.f32 %v1885_v6, %v653_v10  ;;  %v576_v15 = vld [vmem:[#allocation2 + $0x48] ss:$3 sm:$0xff]  ;;  %v584_v16 = vld [vmem:[#allocation2 + $0x49] ss:$3 sm:$0xff]  ;;  %v596_v20 = vld [vmem:[#allocation2 + $0x4a] ss:$3 sm:$0xff] }
 0x107   : > { %v588_v17 = vmax.f32 %v576_v15, %v584_v16 }
 0x108   : > { %v738_v18 = vsub.f32 1.0, %v734_v12  ;;  %v655_v19 = vadd.f32 %v1885_v6, %v654_v13 }
 0x109   : > { %v2216_v23 = vmax.f32 %v588_v17, %v596_v20 }
 0x10a   : > { %v746_v24 = vsub.f32 0.0, %v738_v18  ;;  %v659_v25 = vsel %vm658_vm14, %v1885_v6, %v655_v19 }
 0x10b   : > { %v664_v26 = vsel %vm661_vm15, %v663_v22, %v659_v25  ;;  %v2220_v28 = vmul.f32 0.70710677, %v2216_v23  ;;  %vm1121_vm15 = vcmask 125952  }
 0x10c   : > { %v750_v29 = vsel %vm742_vm0, %v738_v18, %v746_v24  ;;  %v683_v30 = vmul.f32 1.0614054, %v664_v26  ;;  %1122 = vst.msk [vmem:[#allocation5 + $0x10] sm:$0xf] %vm1121_vm15, %v1978_v58  ;;  %v1127_v58 = vld [vmem:[%s2461_s5] sm:$0xff] }
 0x10d   : > { %v754_v32 = vadd.f32 1.0, %v750_v29  ;;  %v612_v33 = vand.u32 2147483647, %v2220_v28  ;;  %vm744_vm8 = vcmp.ge.f32.partialorder %v2220_v28, 0.0  ;;  %v604_v29 = vmul.f32 0.5, %v2216_v23 }
 0x10e   : > { %v687_v36 = vadd.f32 -1.4531521, %v683_v30 }
 0x10f   : > { %v758_v37 = vmul.f32 %v754_v32, %v602_v31  ;;  %v616_v39 = vmul.f32 0.3275911, %v612_v33  ;;  %v720_v5 = vsub.f32 0.0, %v612_v33 }
 0x110   : > { %v691_v41 = vmul.f32 %v687_v36, %v664_v26 }
 0x111   : > { %v620_v42 = vadd.f32 1.0, %v616_v39  ;;  %768 = vst.msk [vmem:[#allocation3 + $0xa] sm:$0xff] %vm557_vm2, %v758_v37  ;;  %v724_v11 = vmul.f32 %v720_v5, %v612_v33 }
 0x112   : > { %v695_v62 = vadd.f32 1.4214138, %v691_v41 }
 0x113   : > { %1888 = vrcp.f32 %v620_v42  ;;  %v677_v55 = vand.u32 2147483648, %v620_v42  ;;  %v675_v60 = vand.u32 2147483647, %v620_v42  ;;  %vm671_vm4 = vweird.f32 %v620_v42 }
 0x114   : > { %v699_v44 = vmul.f32 %v695_v62, %v664_v26  ;;  %1890 = vpow2.f32 %v729_v43  ;;  %v731_v14 = vmul.f32 1.442695, %v724_v11 }
 0x115   : > { %v678_v2 = vor.u32 1.1754944e-38, %v677_v55  ;;  %vm676_vm6 = vcmp.eq.f32.partialorder %v675_v60, 8.507059e+37  ;;  %v1875_v55 = vld [vmem:[%s2460_s4] ss:$0 sm:$0xff] }
 0x116   : > { %v703_v46 = vadd.f32 -0.28449672, %v699_v44  ;;  %1892 = vpow2.f32 %v731_v14 }
 0x118   : > { %v707_v47 = vmul.f32 %v703_v46, %v664_v26  ;;  %v777_v48 = vld [vmem:[#allocation3 + $0x9] sm:$0xff] }
 0x119   : > { %v772_v57 = vld [vmem:[#allocation3 + $0x8] sm:$0xff]  ;;  %v1889_v50 = vpop.eup %1888  ;;  %1781 = vmatmul.msk.f32.gmra.mxu1 %vm557_vm2, %v777_v48 }
 0x11a   : > { %v865_v49 = vld [vmem:[#allocation3 + $0xa] sm:$0xff]  ;;  %1785 = vmatmul.msk.f32.gmra.mxu2 %vm557_vm2, %v772_v57  ;;  %v711_v51 = vadd.f32 0.2548296, %v707_v47  ;;  %v667_v52 = vmul.f32 %v1889_v50, %v620_v42  ;;  %v1891_v35 = vpop.eup %1890  ;;  %vm672_vm1 = vweird.f32 %v1889_v50 }
 0x11b   : > { %1790 = vmatmul.msk.f32.gmra.mxu3 %vm557_vm2, %v865_v49  ;;  %vm673_vm5 = vmor %vm671_vm4, %vm672_vm1  ;;  %v915_v37 = vld [vmem:[#allocation3 + $0x3] sm:$0xff] }
 0x11c   : > { %v715_v53 = vmul.f32 %v711_v51, %v664_v26  ;;  %v668_v54 = vsub.f32 1.0, %v667_v52  ;;  %v1893_v22 = vpop.eup %1892  ;;  %v966_v38 = vld [vmem:[#allocation3 + $0x4] sm:$0xff] }
 0x11e   : > { %v735_v56 = vmul.f32 %v1891_v35, %v715_v53  ;;  %v669_v59 = vmul.f32 %v1889_v50, %v668_v54 }
 0x120   : > { %v739_v63 = vsub.f32 1.0, %v735_v56  ;;  %v670_v0 = vadd.f32 %v1889_v50, %v669_v59 }
 0x122   : > { %v747_v3 = vsub.f32 0.0, %v739_v63  ;;  %v674_v1 = vsel %vm673_vm5, %v1889_v50, %v670_v0 }
 0x123   : > { %v679_v4 = vsel %vm676_vm6, %v678_v2, %v674_v1  ;;  %vm1306_vm6 = vcmask 261120  }
 0x124   : > { %v751_v6 = vsel %vm743_vm7, %v739_v63, %v747_v3  ;;  %v684_v7 = vmul.f32 1.0614054, %v679_v4 }
 0x125   : > { %v755_v9 = vadd.f32 1.0, %v751_v6 }
 0x126   : > { %v688_v10 = vadd.f32 -1.4531521, %v684_v7 }
 0x127   : > { %v759_v21 = vmul.f32 %v755_v9, %v603_v8 }
 0x128   : > { %v692_v12 = vmul.f32 %v688_v10, %v679_v4 }
 0x129   : > { %769 = vst.msk [vmem:[#allocation3 + $0x12] sm:$0xff] %vm557_vm2, %v759_v21 }
 0x12a   : > { %v696_v13 = vadd.f32 1.4214138, %v692_v12 }
 0x12c   : > { %v700_v15 = vmul.f32 %v696_v13, %v679_v4 }
 0x12e   : > { %v704_v16 = vadd.f32 -0.28449672, %v700_v15 }
 0x130   : > { %v708_v17 = vmul.f32 %v704_v16, %v679_v4  ;;  %v778_v45 = vld [vmem:[#allocation3 + $0x11] sm:$0xff] }
 0x131   : > { %v773_v18 = vld [vmem:[#allocation3 + $0x10] sm:$0xff]  ;;  %1782 = vmatmul.msk.f32.gmra.mxu1 %vm557_vm2, %v778_v45 }
 0x132   : > { %v866_v19 = vld [vmem:[#allocation3 + $0x12] sm:$0xff]  ;;  %1786 = vmatmul.msk.f32.gmra.mxu2 %vm557_vm2, %v773_v18  ;;  %v712_v40 = vadd.f32 0.2548296, %v708_v17 }
 0x133   : > { %1791 = vmatmul.msk.f32.gmra.mxu3 %vm557_vm2, %v866_v19  ;;  %v916_v23 = vld [vmem:[#allocation3 + $0xb] sm:$0xff] }
 0x134   : > { %v716_v20 = vmul.f32 %v712_v40, %v679_v4  ;;  %v967_v28 = vld [vmem:[#allocation3 + $0xc] sm:$0xff] }
 0x136   : > { %v736_v24 = vmul.f32 %v1893_v22, %v716_v20 }
 0x138   : > { %v740_v25 = vsub.f32 1.0, %v736_v24 }
 0x13a   : > { %v748_v26 = vsub.f32 0.0, %v740_v25 }
 0x13c   : > { %v752_v27 = vsel %vm744_vm8, %v740_v25, %v748_v26 }
 0x13d   : > { %v756_v30 = vadd.f32 1.0, %v752_v27 }
 0x13f   : > { %v760_v31 = vmul.f32 %v756_v30, %v604_v29 }
 0x141   : > { %770 = vst.msk [vmem:[#allocation3 + $0x1a] sm:$0xff] %vm557_vm2, %v760_v31 }
 0x148   : > { %v779_v32 = vld [vmem:[#allocation3 + $0x19] sm:$0xff] }
 0x149   : > { %v774_v33 = vld [vmem:[#allocation3 + $0x18] sm:$0xff]  ;;  %1783 = vmatmul.msk.f32.gmra.mxu1 %vm557_vm2, %v779_v32 }
 0x14a   : > { %v867_v36 = vld [vmem:[#allocation3 + $0x1a] sm:$0xff]  ;;  %1787 = vmatmul.msk.f32.gmra.mxu2 %vm557_vm2, %v774_v33 }
 0x14b   : > { %1792 = vmatmul.msk.f32.gmra.mxu3 %vm557_vm2, %v867_v36  ;;  %v917_v39 = vld [vmem:[#allocation3 + $0x13] sm:$0xff]  ;;  %v918_v42 = vld [vmem:[#allocation3 + $0x1b] sm:$0xff] }
 0x14c   : > { %v968_v41 = vld [vmem:[#allocation3 + $0x14] sm:$0xff]  ;;  %v969_v62 = vld [vmem:[#allocation3 + $0x1c] sm:$0xff] }
 0x151   : > { %1794 = vmatmul.msk.f32.vlgmr.msrb.gmra.mxu1 %vm557_vm2, %v915_v37 }
 0x152   : > { %1799 = vmatmul.msk.f32.vlgmr.msrb.gmra.mxu2 %vm557_vm2, %v966_v38 }
 0x159   : > { %1795 = vmatmul.msk.f32.gmra.mxu1 %vm557_vm2, %v916_v23 }
 0x15a   : > { %1800 = vmatmul.msk.f32.gmra.mxu2 %vm557_vm2, %v967_v28 }
 0x161   : > { %1796 = vmatmul.msk.f32.gmra.mxu1 %vm557_vm2, %v917_v39 }
 0x162   : > { %1801 = vmatmul.msk.f32.gmra.mxu2 %vm557_vm2, %v968_v41 }
 0x169   : > { %1797 = vmatmul.msk.f32.gmra.mxu1 %vm557_vm2, %v918_v42 }
 0x16a   : > { %1802 = vmatmul.msk.f32.gmra.mxu2 %vm557_vm2, %v969_v62 }
 0x17e   : > { %v811_v43 = vpop.f32.mrf.mxu1 }
 0x185   : > { %v852_v44 = vpop.f32.mrf.mxu2 }
 0x186   : > { %v853_v51 = vadd.f32 %v852_v44, %v811_v43  ;;  %v899_v53 = vpop.f32.mrf.mxu3 }
 0x188   : > { %v911_v54 = vadd.f32 %v899_v53, %v853_v51  ;;  %v1803_v53 = vld [vmem:[%s2461_s5 + $0x10] sm:$0xff] }
 0x196   : > { %v814_v46 = vpop.f32.mrf.mxu1 }
 0x19d   : > { %v855_v47 = vpop.f32.mrf.mxu2 }
 0x19e   : > { %v856_v59 = vadd.f32 %v855_v47, %v814_v46  ;;  %v902_v63 = vpop.f32.mrf.mxu3 }
 0x1a0   : > { %v912_v0 = vadd.f32 %v902_v63, %v856_v59 }
 0x1ae   : > { %v817_v48 = vpop.f32.mrf.mxu1 }
 0x1b5   : > { %v858_v57 = vpop.f32.mrf.mxu2 }
 0x1b6   : > { %v859_v1 = vadd.f32 %v858_v57, %v817_v48  ;;  %v905_v7 = vpop.f32.mrf.mxu3 }
 0x1b8   : > { %v913_v8 = vadd.f32 %v905_v7, %v859_v1  ;;  %v1813_v1 = vld [vmem:[%s2461_s5 + $0x30] sm:$0xff] }
 0x1c6   : > { %v820_v49 = vpop.f32.mrf.mxu1 }
 0x1cd   : > { %v861_v50 = vpop.f32.mrf.mxu2 }
 0x1ce   : > { %v950_v52 = vpop.f32.mrf.mxu1  ;;  %v862_v21 = vadd.f32 %v861_v50, %v820_v49  ;;  %v908_v13 = vpop.f32.mrf.mxu3  ;;  %v1804_v49 = vld [vmem:[%s2461_s5 + $0x18] sm:$0xff]  ;;  %v1810_v50 = vld [vmem:[%s2461_s5 + $0x28] sm:$0xff] }
 0x1cf   : > { %v962_v35 = vadd.f32 %v950_v52, %v911_v54  ;;  %1154 = vmatpush.msrb.mxu3 %v1804_v49  ;;  %1217 = vmatpush.msra.mxu1 %v1810_v50  ;;  %v1809_v54 = vld [vmem:[%s2461_s5 + $0x20] sm:$0xff] }
 0x1d0   : > { %v914_v17 = vadd.f32 %v908_v13, %v862_v21 }
 0x1d1   : > { %1155 = vmatpush.msrb.mxu3 %v1803_v53  ;;  %1218 = vmatpush.msra.mxu1 %v1809_v54  ;;  %v1356_v53 = vld [vmem:[%s2463_s7 + $0x18] sm:$0xff]  ;;  %v1355_v54 = vld [vmem:[%s2463_s7 + $0x10] sm:$0xff] }
 0x1d3   : > { %1376 = vmatpush.msrb.mxu1 %v1356_v53 }
 0x1d5   : > { %v1001_v56 = vpop.f32.mrf.mxu2  ;;  %1377 = vmatpush.msrb.mxu1 %v1355_v54 }
 0x1d6   : > { %v1013_v60 = vadd.f32 %v1001_v56, %v962_v35  ;;  %v953_v61 = vpop.f32.mrf.mxu1 }
 0x1d7   : > { %v963_v2 = vadd.f32 %v953_v61, %v912_v0 }
 0x1d8   : > { %v1021_v34 = vadd.f32 %v1875_v55, %v1013_v60 }
 0x1da   : > { %1026 = vst.msk [vmem:[#allocation4] sm:$0xff] %vm1025_vm9, %v1021_v34 }
 0x1dd   : > { %v1004_v3 = vpop.f32.mrf.mxu2 }
 0x1de   : > { %v1014_v4 = vadd.f32 %v1004_v3, %v963_v2  ;;  %v956_v5 = vpop.f32.mrf.mxu1  ;;  %v1814_v2 = vld [vmem:[%s2461_s5 + $0x38] sm:$0xff]  ;;  %v1128_v3 = vld [vmem:[%s2461_s5 + $0x8] sm:$0xff] }
 0x1df   : > { %v964_v9 = vadd.f32 %v956_v5, %v913_v8  ;;  %1253 = vmatpush.msra.mxu2 %v1814_v2  ;;  %1183 = vmatpush.msra.mxu3 %v1128_v3  ;;  %v1876_v3 = vld [vmem:[%s2462_s6] ss:$0 sm:$0xff] }
 0x1e0   : > { %v1022_v6 = vadd.f32 %v1875_v55, %v1014_v4 }
 0x1e1   : > { %1254 = vmatpush.msra.mxu2 %v1813_v1  ;;  %1184 = vmatpush.msra.mxu3 %v1127_v58 }
 0x1e2   : > { %1027 = vst.msk [vmem:[#allocation4 + $0x8] sm:$0xff] %vm1025_vm9, %v1022_v6 }
 0x1e5   : > { %v1007_v10 = vpop.f32.mrf.mxu2 }
 0x1e6   : > { %v1015_v11 = vadd.f32 %v1007_v10, %v964_v9  ;;  %v959_v16 = vpop.f32.mrf.mxu1 }
 0x1e7   : > { %v965_v19 = vadd.f32 %v959_v16, %v914_v17 }
 0x1e8   : > { %v1023_v12 = vadd.f32 %v1875_v55, %v1015_v11 }
 0x1e9   : > { %v1030_v14 = vld [vmem:[#allocation4] ss:$2 sm:$0xff]  ;;  %v1034_v15 = vld [vmem:[#allocation4 + $0x1] ss:$2 sm:$0xff] }
 0x1ea   : > { %v2264_v45 = vmax.f32 %v1030_v14, %v1034_v15  ;;  %1028 = vst.msk [vmem:[#allocation4 + $0x10] sm:$0xff] %vm1025_vm9, %v1023_v12 }
 0x1ec   : > { %v2268_v18 = vmul.f32 0.70710677, %v2264_v45 }
 0x1ed   : > { %v1010_v40 = vpop.f32.mrf.mxu2 }
 0x1ee   : > { %v1043_v20 = vand.u32 2147483647, %v2268_v18  ;;  %v1016_v22 = vadd.f32 %v1010_v40, %v965_v19  ;;  %vm1109_vm4 = vcmp.ge.f32.partialorder %v2268_v18, 0.0  ;;  %v1818_v18 = vld [vmem:[%s2461_s5 + $0x48] sm:$0xff] }
 0x1f0   : > { %v1045_v24 = vmul.f32 0.3275911, %v1043_v20  ;;  %v1024_v25 = vadd.f32 %v1875_v55, %v1016_v22  ;;  %v1097_v46 = vsub.f32 0.0, %v1043_v20 }
 0x1f2   : > { %v1047_v26 = vadd.f32 1.0, %v1045_v24  ;;  %1029 = vst.msk [vmem:[#allocation4 + $0x18] sm:$0xff] %vm1025_vm9, %v1024_v25  ;;  %v1099_v57 = vmul.f32 %v1097_v46, %v1043_v20  ;;  %v1039_v25 = vmul.f32 0.5, %v2264_v45  ;;  %v1817_v45 = vld [vmem:[%s2461_s5 + $0x40] sm:$0xff] }
 0x1f4   : > { %1894 = vrcp.f32 %v1047_v26  ;;  %v1060_v37 = vand.u32 2147483648, %v1047_v26  ;;  %v1058_v28 = vand.u32 2147483647, %v1047_v26  ;;  %vm1054_vm11 = vweird.f32 %v1047_v26 }
 0x1f5   : > { %v1101_v56 = vmul.f32 1.442695, %v1099_v57 }
 0x1f6   : > { %v1061_v42 = vor.u32 1.1754944e-38, %v1060_v37  ;;  %vm1059_vm13 = vcmp.eq.f32.partialorder %v1058_v28, 8.507059e+37 }
 0x1f9   : > { %v1032_v27 = vld [vmem:[#allocation4 + $0x10] ss:$2 sm:$0xff]  ;;  %v1036_v29 = vld [vmem:[#allocation4 + $0x11] ss:$2 sm:$0xff] }
 0x1fa   : > { %v1895_v30 = vpop.eup %1894  ;;  %v2272_v31 = vmax.f32 %v1032_v27, %v1036_v29 }
 0x1fb   : > { %v1050_v32 = vmul.f32 %v1895_v30, %v1047_v26  ;;  %vm1055_vm10 = vweird.f32 %v1895_v30 }
 0x1fc   : > { %v2275_v33 = vmul.f32 0.70710677, %v2272_v31  ;;  %vm1056_vm12 = vmor %vm1054_vm11, %vm1055_vm10 }
 0x1fd   : > { %v1051_v36 = vsub.f32 1.0, %v1050_v32 }
 0x1fe   : > { %v1044_v38 = vand.u32 2147483647, %v2275_v33  ;;  %vm1110_vm5 = vcmp.ge.f32.partialorder %v2275_v33, 0.0 }
 0x1ff   : > { %v1052_v23 = vmul.f32 %v1895_v30, %v1051_v36 }
 0x200   : > { %v1046_v39 = vmul.f32 0.3275911, %v1044_v38  ;;  %v1098_v10 = vsub.f32 0.0, %v1044_v38 }
 0x201   : > { %v1053_v41 = vadd.f32 %v1895_v30, %v1052_v23 }
 0x202   : > { %v1048_v62 = vadd.f32 1.0, %v1046_v39  ;;  %v1100_v15 = vmul.f32 %v1098_v10, %v1044_v38 }
 0x203   : > { %v1057_v43 = vsel %vm1056_vm12, %v1895_v30, %v1053_v41 }
 0x204   : > { %v1062_v44 = vsel %vm1059_vm13, %v1061_v42, %v1057_v43  ;;  %1896 = vrcp.f32 %v1048_v62  ;;  %v1075_v61 = vand.u32 2147483648, %v1048_v62  ;;  %v1073_v0 = vand.u32 2147483647, %v1048_v62 }
 0x205   : > { %v1079_v47 = vmul.f32 1.0614054, %v1062_v44  ;;  %1898 = vpow2.f32 %v1101_v56  ;;  %vm1069_vm0 = vweird.f32 %v1048_v62  ;;  %v1103_v20 = vmul.f32 1.442695, %v1100_v15  ;;  %v1353_v56 = vld [vmem:[%s2463_s7] sm:$0xff] }
 0x206   : > { %v1076_v6 = vor.u32 1.1754944e-38, %v1075_v61  ;;  %vm1074_vm3 = vcmp.eq.f32.partialorder %v1073_v0, 8.507059e+37 }
 0x207   : > { %v1081_v48 = vadd.f32 -1.4531521, %v1079_v47  ;;  %1900 = vpow2.f32 %v1103_v20 }
 0x209   : > { %v1083_v51 = vmul.f32 %v1081_v48, %v1062_v44 }
 0x20a   : > { %v1897_v52 = vpop.eup %1896 }
 0x20b   : > { %v1085_v35 = vadd.f32 1.4214138, %v1083_v51  ;;  %v1065_v55 = vmul.f32 %v1897_v52, %v1048_v62  ;;  %vm1070_vm14 = vweird.f32 %v1897_v52  ;;  %v1899_v12 = vpop.eup %1898  ;;  %v1040_v62 = vmul.f32 0.5, %v2272_v31 }
 0x20c   : > { %vm1071_vm1 = vmor %vm1069_vm0, %vm1070_vm14 }
 0x20d   : > { %v1087_v59 = vmul.f32 %v1085_v35, %v1062_v44  ;;  %v1066_v60 = vsub.f32 1.0, %v1065_v55  ;;  %v1901_v37 = vpop.eup %1900  ;;  %v1354_v35 = vld [vmem:[%s2463_s7 + $0x8] sm:$0xff] }
 0x20e   : > { %1378 = vmatpush.msrb.mxu1 %v1354_v35 }
 0x20f   : > { %v1089_v34 = vadd.f32 -0.28449672, %v1087_v59  ;;  %v1067_v63 = vmul.f32 %v1897_v52, %v1066_v60 }
 0x210   : > { %1379 = vmatpush.msrb.mxu1 %v1353_v56 }
 0x211   : > { %v1091_v4 = vmul.f32 %v1089_v34, %v1062_v44  ;;  %v1068_v5 = vadd.f32 %v1897_v52, %v1067_v63 }
 0x213   : > { %v1093_v7 = vadd.f32 0.2548296, %v1091_v4  ;;  %v1072_v8 = vsel %vm1071_vm1, %v1897_v52, %v1068_v5 }
 0x214   : > { %v1077_v9 = vsel %vm1074_vm3, %v1076_v6, %v1072_v8 }
 0x215   : > { %v1095_v21 = vmul.f32 %v1093_v7, %v1062_v44  ;;  %v1080_v11 = vmul.f32 1.0614054, %v1077_v9 }
 0x217   : > { %v1105_v13 = vmul.f32 %v1899_v12, %v1095_v21  ;;  %v1082_v14 = vadd.f32 -1.4531521, %v1080_v11 }
 0x219   : > { %v1107_v16 = vsub.f32 1.0, %v1105_v13  ;;  %v1084_v17 = vmul.f32 %v1082_v14, %v1077_v9 }
 0x21b   : > { %v1111_v19 = vsub.f32 0.0, %v1107_v16  ;;  %v1086_v40 = vadd.f32 1.4214138, %v1084_v17 }
 0x21d   : > { %v1113_v22 = vsel %vm1109_vm4, %v1107_v16, %v1111_v19  ;;  %v1088_v24 = vmul.f32 %v1086_v40, %v1077_v9 }
 0x21e   : > { %v1115_v26 = vadd.f32 1.0, %v1113_v22 }
 0x21f   : > { %v1090_v27 = vadd.f32 -0.28449672, %v1088_v24 }
 0x220   : > { %v1117_v29 = vmul.f32 %v1115_v26, %v1039_v25 }
 0x221   : > { %v1092_v30 = vmul.f32 %v1090_v27, %v1077_v9 }
 0x222   : > { %1123 = vst.msk [vmem:[#allocation5 + $0x2] sm:$0xff] %vm1025_vm9, %v1117_v29 }
 0x223   : > { %v1094_v32 = vadd.f32 0.2548296, %v1092_v30 }
 0x225   : > { %v1096_v36 = vmul.f32 %v1094_v32, %v1077_v9 }
 0x227   : > { %v1106_v38 = vmul.f32 %v1901_v37, %v1096_v36 }
 0x229   : > { %v1108_v23 = vsub.f32 1.0, %v1106_v38  ;;  %v1129_v28 = vld [vmem:[#allocation5 + $0x1] sm:$0xff] }
 0x22a   : > { %v1192_v39 = vld [vmem:[#allocation5 + $0x2] sm:$0xff]  ;;  %1805 = vmatmul.msk.f32.vlgmr.msrb.gmra.mxu3 %vm1025_vm9, %v1129_v28 }
 0x22b   : > { %1811 = vmatmul.msk.f32.vlgmr.msra.gmra.mxu1 %vm1025_vm9, %v1192_v39  ;;  %v1112_v41 = vsub.f32 0.0, %v1108_v23  ;;  %1289 = vmatpush.msrb.mxu3 %v1818_v18  ;;  %v1125_v57 = vld [vmem:[#allocation5] sm:$0xff] }
 0x22d   : > { %v1114_v42 = vsel %vm1110_vm5, %v1108_v23, %v1112_v41  ;;  %1290 = vmatpush.msrb.mxu3 %v1817_v45 }
 0x22e   : > { %v1116_v43 = vadd.f32 1.0, %v1114_v42 }
 0x230   : > { %v1118_v44 = vmul.f32 %v1116_v43, %v1040_v62 }
 0x232   : > { %1124 = vst.msk [vmem:[#allocation5 + $0xa] sm:$0xff] %vm1025_vm9, %v1118_v44 }
 0x239   : > { %v1130_v46 = vld [vmem:[#allocation5 + $0x9] sm:$0xff] }
 0x23a   : > { %v1193_v47 = vld [vmem:[#allocation5 + $0xa] sm:$0xff]  ;;  %1806 = vmatmul.msk.f32.gmra.mxu3 %vm1025_vm9, %v1130_v46 }
 0x23b   : > { %v1228_v48 = vld [vmem:[#allocation5 + $0x3] sm:$0xff]  ;;  %1812 = vmatmul.msk.f32.gmra.mxu1 %vm1025_vm9, %v1193_v47  ;;  %v1229_v33 = vld [vmem:[#allocation5 + $0xb] sm:$0xff] }
 0x23c   : > { %1815 = vmatmul.msk.f32.vlgmr.msra.gmra.mxu2 %vm1025_vm9, %v1228_v48  ;;  %v1126_v31 = vld [vmem:[#allocation5 + $0x8] sm:$0xff] }
 0x23d   : > { %v1264_v49 = vld [vmem:[#allocation5 + $0x4] sm:$0xff]  ;;  %v1265_v50 = vld [vmem:[#allocation5 + $0xc] sm:$0xff] }
 0x242   : > { %1807 = vmatmul.msk.f32.vlgmr.msra.gmra.mxu3 %vm1025_vm9, %v1125_v57 }
 0x244   : > { %1816 = vmatmul.msk.f32.gmra.mxu2 %vm1025_vm9, %v1229_v33 }
 0x24a   : > { %1808 = vmatmul.msk.f32.gmra.mxu3 %vm1025_vm9, %v1126_v31 }
 0x252   : > { %1819 = vmatmul.msk.f32.vlgmr.msrb.gmra.mxu3 %vm1025_vm9, %v1264_v49  ;;  %v1877_v49 = vld [vmem:[%s2464_s8] ss:$0 sm:$0xff] }
 0x25a   : > { %1820 = vmatmul.msk.f32.gmra.mxu3 %vm1025_vm9, %v1265_v50 }
 0x2a8   : > { %v1220_v61 = vpop.f32.mrf.mxu1 }
 0x2ad   : > { %v1157_v51 = vpop.f32.mrf.mxu3 }
 0x2b8   : > { %v1223_v5 = vpop.f32.mrf.mxu1 }
 0x2bd   : > { %v1160_v52 = vpop.f32.mrf.mxu3 }
 0x2bf   : > { %v1256_v63 = vpop.f32.mrf.mxu2 }
 0x2c5   : > { %v1186_v55 = vpop.f32.mrf.mxu3 }
 0x2c6   : > { %v1187_v59 = vadd.f32 %v1186_v55, %v1157_v51 }
 0x2c7   : > { %v1259_v8 = vpop.f32.mrf.mxu2 }
 0x2c8   : > { %v1226_v34 = vadd.f32 %v1220_v61, %v1187_v59 }
 0x2ca   : > { %v1262_v2 = vadd.f32 %v1256_v63, %v1226_v34 }
 0x2cd   : > { %v1189_v60 = vpop.f32.mrf.mxu3 }
 0x2ce   : > { %v1190_v0 = vadd.f32 %v1189_v60, %v1160_v52 }
 0x2d0   : > { %v1227_v6 = vadd.f32 %v1223_v5, %v1190_v0  ;;  %v1454_v5 = vld [vmem:[%s2465_s9 + $0x10] sm:$0xff] }
 0x2d2   : > { %v1263_v9 = vadd.f32 %v1259_v8, %v1227_v6  ;;  %v1482_v6 = vld [vmem:[%s2465_s9 + $0x28] sm:$0xff] }
 0x2d3   : > { %1500 = vmatpush.msra.mxu1 %v1482_v6 }
 0x2d5   : > { %v1292_v1 = vpop.f32.mrf.mxu3 }
 0x2d6   : > { %v1298_v4 = vadd.f32 %v1292_v1, %v1262_v2  ;;  %v1428_v2 = vld [vmem:[%s2465_s9 + $0x8] sm:$0xff]  ;;  %v1427_v1 = vld [vmem:[%s2465_s9] sm:$0xff] }
 0x2d7   : > { %1446 = vmatpush.msrb.mxu2 %v1428_v2  ;;  %v1643_v2 = vld [vmem:[%s2468_s12] sm:$0x1] }
 0x2d8   : > { %v1304_v7 = vadd.f32 %v1876_v3, %v1298_v4 }
 0x2d9   : > { %1447 = vmatpush.msrb.mxu2 %v1427_v1 }
 0x2da   : > { %1307 = vst.msk [vmem:[#allocation6] sm:$0xff] %vm1306_vm6, %v1304_v7  ;;  %v1481_v7 = vld [vmem:[%s2465_s9 + $0x20] sm:$0xff] }
 0x2db   : > { %1501 = vmatpush.msra.mxu1 %v1481_v7 }
 0x2dd   : > { %v1295_v10 = vpop.f32.mrf.mxu3 }
 0x2de   : > { %v1299_v21 = vadd.f32 %v1295_v10, %v1263_v9 }
 0x2e0   : > { %v1305_v11 = vadd.f32 %v1876_v3, %v1299_v21  ;;  %v1455_v3 = vld [vmem:[%s2465_s9 + $0x18] sm:$0xff] }
 0x2e1   : > { %1473 = vmatpush.msra.mxu3 %v1455_v3 }
 0x2e2   : > { %1308 = vst.msk [vmem:[#allocation6 + $0x8] sm:$0xff] %vm1306_vm6, %v1305_v11 }
 0x2e3   : > { %1474 = vmatpush.msra.mxu3 %v1454_v5 }
 0x2e9   : > { %v1309_v12 = vld [vmem:[#allocation6] ss:$2 sm:$0xff]  ;;  %v1311_v13 = vld [vmem:[#allocation6 + $0x1] ss:$2 sm:$0xff] }
 0x2ea   : > { %v1312_v14 = vmax.f32 %v1309_v12, %v1311_v13 }
 0x2ec   : > { %v1314_v15 = vmul.f32 0.70710677, %v1312_v14  ;;  %v1313_v57 = vmul.f32 0.5, %v1312_v14  ;;  %v1509_v14 = vld [vmem:[%s2465_s9 + $0x38] sm:$0xff] }
 0x2ed   : > { %1527 = vmatpush.msra.mxu2 %v1509_v14 }
 0x2ee   : > { %v1315_v16 = vand.u32 2147483647, %v1314_v15  ;;  %vm1348_vm12 = vcmp.ge.f32.partialorder %v1314_v15, 0.0  ;;  %v1536_v15 = vld [vmem:[%s2465_s9 + $0x48] sm:$0xff] }
 0x2ef   : > { %1554 = vmatpush.msrb.mxu3 %v1536_v15 }
 0x2f0   : > { %v1316_v17 = vmul.f32 0.3275911, %v1315_v16  ;;  %v1342_v32 = vsub.f32 0.0, %v1315_v16 }
 0x2f2   : > { %v1317_v58 = vadd.f32 1.0, %v1316_v17  ;;  %v1343_v38 = vmul.f32 %v1342_v32, %v1315_v16  ;;  %v1508_v16 = vld [vmem:[%s2465_s9 + $0x30] sm:$0xff] }
 0x2f3   : > { %1528 = vmatpush.msra.mxu2 %v1508_v16 }
 0x2f4   : > { %1902 = vrcp.f32 %v1317_v58  ;;  %v1329_v22 = vand.u32 2147483648, %v1317_v58  ;;  %v1327_v25 = vand.u32 2147483647, %v1317_v58  ;;  %vm1323_vm8 = vweird.f32 %v1317_v58 }
 0x2f5   : > { %v1344_v28 = vmul.f32 1.442695, %v1343_v38 }
 0x2f6   : > { %v1330_v27 = vor.u32 1.1754944e-38, %v1329_v22  ;;  %vm1328_vm11 = vcmp.eq.f32.partialorder %v1327_v25, 8.507059e+37 }
 0x2f7   : > { %1904 = vpow2.f32 %v1344_v28  ;;  %v1617_v28 = vld [vmem:[%s2465_s9 + $0x78] sm:$0xff] }
 0x2fa   : > { %v1903_v19 = vpop.eup %1902 }
 0x2fb   : > { %v1319_v40 = vmul.f32 %v1903_v19, %v1317_v58  ;;  %vm1324_vm7 = vweird.f32 %v1903_v19  ;;  %v1563_v58 = vld [vmem:[%s2465_s9 + $0x58] sm:$0xff] }
 0x2fc   : > { %vm1325_vm10 = vmor %vm1323_vm8, %vm1324_vm7 }
 0x2fd   : > { %v1320_v20 = vsub.f32 1.0, %v1319_v40  ;;  %v1905_v43 = vpop.eup %1904  ;;  %v1562_v40 = vld [vmem:[%s2465_s9 + $0x50] sm:$0xff] }
 0x2ff   : > { %v1321_v24 = vmul.f32 %v1903_v19, %v1320_v20 }
 0x301   : > { %v1322_v26 = vadd.f32 %v1903_v19, %v1321_v24 }
 0x303   : > { %v1326_v29 = vsel %vm1325_vm10, %v1903_v19, %v1322_v26  ;;  %v1535_v19 = vld [vmem:[%s2465_s9 + $0x40] sm:$0xff] }
 0x304   : > { %v1331_v30 = vsel %vm1328_vm11, %v1330_v27, %v1326_v29  ;;  %1555 = vmatpush.msrb.mxu3 %v1535_v19 }
 0x305   : > { %v1333_v36 = vmul.f32 1.0614054, %v1331_v30 }
 0x307   : > { %v1334_v37 = vadd.f32 -1.4531521, %v1333_v36 }
 0x309   : > { %v1335_v18 = vmul.f32 %v1334_v37, %v1331_v30 }
 0x30b   : > { %v1336_v23 = vadd.f32 1.4214138, %v1335_v18 }
 0x30d   : > { %v1337_v39 = vmul.f32 %v1336_v23, %v1331_v30  ;;  %v1590_v23 = vld [vmem:[%s2465_s9 + $0x68] sm:$0xff] }
 0x30f   : > { %v1338_v45 = vadd.f32 -0.28449672, %v1337_v39 }
 0x311   : > { %v1339_v41 = vmul.f32 %v1338_v45, %v1331_v30 }
 0x313   : > { %v1340_v42 = vadd.f32 0.2548296, %v1339_v41 }
 0x315   : > { %v1341_v62 = vmul.f32 %v1340_v42, %v1331_v30  ;;  %v1589_v42 = vld [vmem:[%s2465_s9 + $0x60] sm:$0xff] }
 0x317   : > { %v1346_v44 = vmul.f32 %v1905_v43, %v1341_v62  ;;  %v1616_v62 = vld [vmem:[%s2465_s9 + $0x70] sm:$0xff] }
 0x319   : > { %v1347_v46 = vsub.f32 1.0, %v1346_v44 }
 0x31b   : > { %v1349_v47 = vsub.f32 0.0, %v1347_v46 }
 0x31d   : > { %v1350_v48 = vsel %vm1348_vm12, %v1347_v46, %v1349_v47 }
 0x31e   : > { %v1351_v33 = vadd.f32 1.0, %v1350_v48 }
 0x320   : > { %v1352_v31 = vmul.f32 %v1351_v33, %v1313_v57  ;;  %v1642_v57 = vld [vmem:[%s2467_s11] sm:$0xff] }
 0x321   : > { %v1425_v33 = vld [vmem:[%s2466_s10] sm:$0x1] }
 0x322   : > { %1821 = vmatmul.msk.f32.vlgmr.msrb.gmra.mxu1 %vm1306_vm6, %v1352_v31 }
 0x323   : > { %1581 = vmatpush.msrb.mxu1 %v1563_v58 }
 0x325   : > { %1582 = vmatpush.msrb.mxu1 %v1562_v40 }
 0x39f   : > { %v1381_v50 = vpop.f32.mrf.mxu1 }
 0x3a0   : > { %v2346_v51 = vadd.f32 %v1877_v49, %v1381_v50 }
 0x3a2   : > { %v2349_v52 = vmul.f32 0.70710677, %v2346_v51  ;;  %v1384_v37 = vmul.f32 0.5, %v2346_v51 }
 0x3a4   : > { %v1386_v53 = vand.u32 2147483647, %v2349_v52  ;;  %vm1419_vm1 = vcmp.ge.f32.partialorder %v2349_v52, 0.0 }
 0x3a6   : > { %v1387_v54 = vmul.f32 0.3275911, %v1386_v53  ;;  %v1413_v9 = vsub.f32 0.0, %v1386_v53 }
 0x3a8   : > { %v1388_v35 = vadd.f32 1.0, %v1387_v54  ;;  %v1414_v11 = vmul.f32 %v1413_v9, %v1386_v53 }
 0x3aa   : > { %1906 = vrcp.f32 %v1388_v35  ;;  %v1400_v60 = vand.u32 2147483648, %v1388_v35  ;;  %v1398_v34 = vand.u32 2147483647, %v1388_v35  ;;  %vm1394_vm14 = vweird.f32 %v1388_v35 }
 0x3ab   : > { %v1415_v17 = vmul.f32 1.442695, %v1414_v11 }
 0x3ac   : > { %v1401_v0 = vor.u32 1.1754944e-38, %v1400_v60  ;;  %vm1399_vm0 = vcmp.eq.f32.partialorder %v1398_v34, 8.507059e+37 }
 0x3ad   : > { %1908 = vpow2.f32 %v1415_v17 }
 0x3b0   : > { %v1907_v55 = vpop.eup %1906 }
 0x3b1   : > { %v1390_v56 = vmul.f32 %v1907_v55, %v1388_v35  ;;  %vm1395_vm13 = vweird.f32 %v1907_v55 }
 0x3b2   : > { %vm1396_vm15 = vmor %vm1394_vm14, %vm1395_vm13 }
 0x3b3   : > { %v1391_v59 = vsub.f32 1.0, %v1390_v56  ;;  %v1909_v27 = vpop.eup %1908 }
 0x3b5   : > { %v1392_v61 = vmul.f32 %v1907_v55, %v1391_v59 }
 0x3b7   : > { %v1393_v63 = vadd.f32 %v1907_v55, %v1392_v61 }
 0x3b9   : > { %v1397_v4 = vsel %vm1396_vm15, %v1907_v55, %v1393_v63 }
 0x3ba   : > { %v1402_v8 = vsel %vm1399_vm0, %v1401_v0, %v1397_v4 }
 0x3bb   : > { %v1404_v10 = vmul.f32 1.0614054, %v1402_v8 }
 0x3bd   : > { %v1405_v21 = vadd.f32 -1.4531521, %v1404_v10 }
 0x3bf   : > { %v1406_v12 = vmul.f32 %v1405_v21, %v1402_v8 }
 0x3c1   : > { %v1407_v13 = vadd.f32 1.4214138, %v1406_v12 }
 0x3c3   : > { %v1408_v20 = vmul.f32 %v1407_v13, %v1402_v8 }
 0x3c5   : > { %v1409_v22 = vadd.f32 -0.28449672, %v1408_v20 }
 0x3c7   : > { %v1410_v24 = vmul.f32 %v1409_v22, %v1402_v8 }
 0x3c9   : > { %v1411_v25 = vadd.f32 0.2548296, %v1410_v24 }
 0x3cb   : > { %v1412_v26 = vmul.f32 %v1411_v25, %v1402_v8 }
 0x3cd   : > { %v1417_v29 = vmul.f32 %v1909_v27, %v1412_v26 }
 0x3cf   : > { %v1418_v30 = vsub.f32 1.0, %v1417_v29 }
 0x3d1   : > { %v1420_v32 = vsub.f32 0.0, %v1418_v30 }
 0x3d3   : > { %v1421_v36 = vsel %vm1419_vm1, %v1418_v30, %v1420_v32 }
 0x3d4   : > { %v1422_v38 = vadd.f32 1.0, %v1421_v36 }
 0x3d6   : > { %v1423_v18 = vmul.f32 %v1422_v38, %v1384_v37 }
 0x3d8   : > { %1424 = vst.msk [vmem:[#allocation7] sm:$0xff] %vm1025_vm9, %v1423_v18 }
 0x3df   : > { %v1426_v39 = vld [vmem:[#allocation7] sm:$0x1]  ;;  %v1453_v45 = vld [vmem:[#allocation7 + $0x1] sm:$0x1]  ;;  %v1480_v41 = vld [vmem:[#allocation7 + $0x2] sm:$0x1] }
 0x3e0   : > { %1822 = vmatmul.msk.f32.vlgmr.msrb.gmra.mxu2 %vm1025_vm9, %v1426_v39  ;;  %1823 = vmatmul.msk.f32.vlgmr.msra.gmra.mxu3 %vm1025_vm9, %v1453_v45  ;;  %v1507_v43 = vld [vmem:[#allocation7 + $0x3] sm:$0x1]  ;;  %v1534_v44 = vld [vmem:[#allocation7 + $0x4] sm:$0x1]  ;;  %v1561_v46 = vld [vmem:[#allocation7 + $0x5] sm:$0x1] }
 0x3e1   : > { %1824 = vmatmul.msk.f32.vlgmr.msra.gmra.mxu1 %vm1025_vm9, %v1480_v41  ;;  %1608 = vmatpush.msrb.mxu2 %v1590_v23  ;;  %v1588_v47 = vld [vmem:[#allocation7 + $0x6] sm:$0x1]  ;;  %v1615_v48 = vld [vmem:[#allocation7 + $0x7] sm:$0x1] }
 0x3e2   : > { %1635 = vmatpush.msra.mxu3 %v1617_v28  ;;  %1662 = vmatpush.msra.mxu1 %v1642_v57 }
 0x3e3   : > { %1609 = vmatpush.msrb.mxu2 %v1589_v42 }
 0x3e4   : > { %1636 = vmatpush.msra.mxu3 %v1616_v62 }
 0x3e8   : > { %1825 = vmatmul.msk.f32.vlgmr.msra.gmra.mxu2 %vm1025_vm9, %v1507_v43  ;;  %1826 = vmatmul.msk.f32.vlgmr.msrb.gmra.mxu3 %vm1025_vm9, %v1534_v44 }
 0x3e9   : > { %1827 = vmatmul.msk.f32.vlgmr.msrb.gmra.mxu1 %vm1025_vm9, %v1561_v46 }
 0x3f0   : > { %1828 = vmatmul.msk.f32.vlgmr.msrb.gmra.mxu2 %vm1025_vm9, %v1588_v47  ;;  %1829 = vmatmul.msk.f32.vlgmr.msra.gmra.mxu3 %vm1025_vm9, %v1615_v48  ;;  %vm1667_vm9 = vcmask 40960  }
 0x45e   : > { %v1503_v52 = vpop.f32.mrf.mxu1 }
 0x463   : > { %v1449_v31 = vpop.f32.mrf.mxu2  ;;  %v1476_v49 = vpop.f32.mrf.mxu3 }
 0x464   : > { %v1452_v50 = vadd.f32 %v1449_v31, %v1425_v33 }
 0x466   : > { %v1479_v51 = vadd.f32 %v1476_v49, %v1452_v50  ;;  %v1584_v59 = vpop.f32.mrf.mxu1 }
 0x468   : > { %v1506_v53 = vadd.f32 %v1503_v52, %v1479_v51 }
 0x46b   : > { %v1530_v54 = vpop.f32.mrf.mxu2  ;;  %v1557_v35 = vpop.f32.mrf.mxu3 }
 0x46c   : > { %v1533_v55 = vadd.f32 %v1530_v54, %v1506_v53 }
 0x46e   : > { %v1560_v56 = vadd.f32 %v1557_v35, %v1533_v55 }
 0x470   : > { %v1587_v60 = vadd.f32 %v1584_v59, %v1560_v56 }
 0x473   : > { %v1611_v61 = vpop.f32.mrf.mxu2  ;;  %v1638_v63 = vpop.f32.mrf.mxu3 }
 0x474   : > { %v1614_v34 = vadd.f32 %v1611_v61, %v1587_v60 }
 0x476   : > { %v1641_v0 = vadd.f32 %v1638_v63, %v1614_v34 }
 0x478   : > { %1830 = vmatmul.msk.f32.vlgmr.msra.gmra.mxu1 %vm557_vm2, %v1641_v0 }
 0x4f5   : > { %v1664_v3 = vpop.f32.mrf.mxu1 }
 0x4f6   : > { %v1665_v1 = vadd.f32 %v1664_v3, %v1643_v2 }
 0x4f8   : > { %v1668_v4 = vsel %vm1667_vm9, %v1665_v1, -inf }
 0x4f9   : > { %1669 = vmax.xlane.f32.xlu0 %v1668_v4 }
 0x56c   : > { %v1670_v5 = vpop.xlane.xlu0 %1669 }
 0x56d   : > { %v1671_v6 = vsub.f32 %v1665_v1, %v1670_v5 }
 0x56f   : > { %v1672_v7 = vmul.f32 1.442695, %v1671_v6 }
 0x571   : > { %1910 = vpow2.f32 %v1672_v7 }
 0x577   : > { %v1911_v8 = vpop.eup %1910 }
 0x578   : > { %v1674_v9 = vsel %vm1667_vm9, %v1911_v8, 0.0 }
 0x579   : > { %1675 = vadd.xlane.f32.xlu0 %v1674_v9 }
 0x5ec   : > { %v1676_v10 = vpop.xlane.xlu0 %1675 }
 0x5ed   : > { %1912 = vrcp.f32 %v1676_v10  ;;  %v1688_v13 = vand.u32 2147483648, %v1676_v10  ;;  %v1686_v15 = vand.u32 2147483647, %v1676_v10  ;;  %vm1682_vm3 = vweird.f32 %v1676_v10 }
 0x5ef   : > { %v1689_v17 = vor.u32 1.1754944e-38, %v1688_v13  ;;  %vm1687_vm5 = vcmp.eq.f32.partialorder %v1686_v15, 8.507059e+37 }
 0x5f3   : > { %v1913_v21 = vpop.eup %1912 }
 0x5f4   : > { %v1678_v11 = vmul.f32 %v1913_v21, %v1676_v10  ;;  %vm1683_vm2 = vweird.f32 %v1913_v21 }
 0x5f5   : > { %vm1684_vm4 = vmor %vm1682_vm3, %vm1683_vm2 }
 0x5f6   : > { %v1679_v12 = vsub.f32 1.0, %v1678_v11 }
 0x5f8   : > { %v1680_v14 = vmul.f32 %v1913_v21, %v1679_v12 }
 0x5fa   : > { %v1681_v16 = vadd.f32 %v1913_v21, %v1680_v14 }
 0x5fc   : > { %v1685_v58 = vsel %vm1684_vm4, %v1913_v21, %v1681_v16 }
 0x5fd   : > { %v1690_v19 = vsel %vm1687_vm5, %v1689_v17, %v1685_v58 }
 0x5fe   : > { %v1691_v40 = vmul.f32 %v1911_v8, %v1690_v19 }
 0x600   : > { %1692 = vst.msk [vmem:[%s432_s16] sm:$0x1] %vm1667_vm9, %v1691_v40 }
 0x601   : > { %1941 = shalt.err (!%p1938_p3)
}
 0x602   : > { %1834 = dma.vmem_to_hbm [thread:$0]  (%p2087_p5), %s1705_s17, 16, %s1707_s21, %s1694_s25  }
 0x603 PF: > { %s2482_s23 = sld [smem:[#allocation11_spill]]  ;;  %p1840_p4 = scmp.ge.s32.totalorder %s1976_s28, 2 }
 0x605   : > { %p1837_p7 = pnand %p1840_p4, %p2091_p6 }
 0x607   : > { %p1838_p8 = pneg %p1837_p7 }
 0x609   : > { %s1718_s15 = sand.u32 1, %s2482_s23  }
 0x60a   : > { %s1719_s16 = scalar_lea.sflag [#allocation9], %s1718_s15 }
 0x60b   : > { %1959 = dma.done.wait (%p1838_p8), %s1719_s16, 16  }
 0x60c   : > { %1961 = vsyncadd (%p1838_p8), %s1719_s16, 4294967280  ;;  %s2484_s28 = sld [smem:[#allocation13_spill]]  ;;  %s2487_s25 = smov %s1968_s26 }
 0x60d   : > { %s2485_s27 = sld [smem:[#allocation12_spill]] }
 0x60e   : > { %s2486_s29 = sld [smem:[#allocation14_spill]] }
 0x612   : > { %p23_p9 = scmp.ge.s32.totalorder %s2484_s28, 4  }
 0x613   : > { %s2488_s26 = smov %s2485_s27 }
 0x614   : > { %s2489_s27 = smov %s2486_s29  ;;  %25 = sbr.rel (!%p23_p9) target bundleno = 3 (0x3), region = 130 }
 0x619   :  { %1724 = vsyncpa [#allocation9], 1 }
 0x61a   :  { %1726 = vsyncpa [#allocation9 + $0x1], 1 }

</bundles_post_ra>
